<compile_context>
chip_gen: v7x
topology: tpu7x:2x2x1
jax: 0.10.0
libtpu: 0.0.40
codegen_flags: <defaults>
</compile_context>

<pallas_src>
import functools
import math

import jax
import jax.numpy as jnp
from jax.experimental import pallas as pl
from jax.experimental.pallas import tpu as pltpu


def _cross_layer_kernel(nhead, n_batch,
                        src_ref, tgt_ref, spos_ref, tpos_ref,
                        wa_ref, w2t_ref, b_ref,
                        osrc_ref, otgt_ref):
    """Whole TransformerCrossLayer (post-norm) for this grid step's query rows.

    src_ref/spos_ref : (Rs, E)   seq-first flattened src / src_pos (Rs = S*N)
    tgt_ref/tpos_ref : (Rt, E)   seq-first flattened tgt / tgt_pos (Rt = T*N)
    wa_ref           : (E, 5*BLK)  [Wq^T*scale | Wk^T | Wv^T | Wo^T | W1^T],
                       each block zero-padded to a 128-lane boundary (BLK)
    w2t_ref          : (BLK, E)  W2^T zero-padded along rows
    b_ref            : (10, BLK) rows: bq*scale, bk, bv, bo, b1, b2,
                                       g2, be2, g3, be3
    osrc_ref         : (hs, E)   this step's src output rows
    otgt_ref         : (ht, E)   this step's tgt output rows
    """
    E = src_ref.shape[-1]
    dh = E // nhead
    Rs, Rt = src_ref.shape[0], tgt_ref.shape[0]
    Rk = Rs + Rt
    hs, ht = osrc_ref.shape[0], otgt_ref.shape[0]
    Rq = hs + ht
    BLK = wa_ref.shape[1] // 5

    step = pl.program_id(0)
    off_s = step * hs
    off_t = step * ht
    if hs % 8 == 0:
        off_s = pl.multiple_of(off_s, 8)
    if ht % 8 == 0:
        off_t = pl.multiple_of(off_t, 8)

    wa = wa_ref[...]
    w2t = w2t_ref[...]
    b = b_ref[...]

    # ---- key/value side: full rows of BOTH streams (order: [src; tgt]) ----
    src_all = src_ref[...]
    tgt_all = tgt_ref[...]
    x_all = jnp.concatenate([src_all, tgt_all], axis=0)                 # (Rk,E)
    xwp_all = jnp.concatenate([src_all + spos_ref[...],
                               tgt_all + tpos_ref[...]], axis=0)        # (Rk,E)

    # ---- query side: this step's half rows of both streams ----------------
    src_h = src_ref[pl.ds(off_s, hs), :]
    tgt_h = tgt_ref[pl.ds(off_t, ht), :]
    x_q = jnp.concatenate([src_h, tgt_h], axis=0)                       # (Rq,E)
    xwp_q = x_q + jnp.concatenate([spos_ref[pl.ds(off_s, hs), :],
                                   tpos_ref[pl.ds(off_t, ht), :]], axis=0)

    # ---- shared in-projections (one matmul each, lane-aligned blocks) -----
    # Results are 128-lane wide; lanes E: are exact zeros (padded weights).
    q = jnp.dot(xwp_q, wa[:, 0:BLK],
                preferred_element_type=jnp.float32) + b[0:1, :]         # scaled
    k = jnp.dot(xwp_all, wa[:, BLK:2 * BLK],
                preferred_element_type=jnp.float32) + b[1:2, :]
    v = jnp.dot(x_all, wa[:, 2 * BLK:3 * BLK],
                preferred_element_type=jnp.float32) + b[2:3, :]

    # ---- in-kernel mask: same batch AND opposite stream --------------------
    r = jax.lax.broadcasted_iota(jnp.int32, (Rq, Rk), 0)
    c = jax.lax.broadcasted_iota(jnp.int32, (Rq, Rk), 1)
    r_is_src = r < hs
    r_batch = jnp.where(r_is_src, (r + off_s) % n_batch,
                        (r - hs + off_t) % n_batch)
    c_is_src = c < Rs
    c_batch = jnp.where(c_is_src, c % n_batch, (c - Rs) % n_batch)
    allowed = jnp.logical_and(r_batch == c_batch, r_is_src != c_is_src)
    neg = jnp.where(allowed, 0.0, -1e30).astype(jnp.float32)            # (Rq,Rk)

    # ---- attention: per-head scores, heads stacked for ONE softmax --------
    s = jnp.stack(
        [jax.lax.dot_general(q[:, h * dh:(h + 1) * dh],
                             k[:, h * dh:(h + 1) * dh],
                             (((1,), (1,)), ((), ())),
                             preferred_element_type=jnp.float32)
         for h in range(nhead)], axis=0)                                # (H,Rq,Rk)
    s = s + neg[None, :, :]
    s = s - jnp.max(s, axis=-1, keepdims=True)
    p = jnp.exp(s)
    p = p * pl.reciprocal(jnp.sum(p, axis=-1, keepdims=True), approx=True)

    # head outputs assembled into lanes, then ONE (E,E) out-projection
    o = jnp.concatenate(
        [jnp.dot(p[h], v[:, h * dh:(h + 1) * dh],
                 preferred_element_type=jnp.float32)
         for h in range(nhead)], axis=1)                                # (Rq,E)
    attn = jnp.dot(o, wa[:, 3 * BLK:3 * BLK + E],
                   preferred_element_type=jnp.float32) + b[3:4, :E]

    # ---- shared residual + norm2 + FFN + norm3 for both streams -----------
    def layer_norm(x, g, be):
        mu = jnp.mean(x, axis=-1, keepdims=True)
        xc = x - mu
        var = jnp.mean(xc * xc, axis=-1, keepdims=True)
        return xc * jax.lax.rsqrt(var + 1e-5) * g + be

    y = layer_norm(x_q + attn, b[6:7, :E], b[7:8, :E])                  # norm2
    h1 = jnp.maximum(jnp.dot(y, wa[:, 4 * BLK:5 * BLK],
                             preferred_element_type=jnp.float32) + b[4:5, :],
                     0.0)                                               # (Rq,BLK)
    ff = jnp.dot(h1, w2t, preferred_element_type=jnp.float32) + b[5:6, :E]
    out = layer_norm(y + ff, b[8:9, :E], b[9:10, :E])                   # norm3

    osrc_ref[...] = out[:hs]
    otgt_ref[...] = out[hs:]


def pack_params(params, nhead):
    """Host-side, ONE-TIME packing: pre-transposed, lane-aligned weight slabs.

    Called once outside the per-forward path (perf-review item 3)."""
    E = params["out_proj_weight"].shape[0]
    F = params["linear1_weight"].shape[0]
    dh = E // nhead
    scale = 1.0 / math.sqrt(dh)
    BLK = 128 * (-(-max(E, F) // 128))          # lane-tile aligned block width

    def blk(w_t):                                # (E, w) -> (E, BLK)
        return jnp.pad(w_t, ((0, 0), (0, BLK - w_t.shape[1])))

    ipw, ipb = params["in_proj_weight"], params["in_proj_bias"]
    wa = jnp.concatenate([
        blk(ipw[:E].T * scale),                  # Wq^T (scale folded in)
        blk(ipw[E:2 * E].T),                     # Wk^T
        blk(ipw[2 * E:].T),                      # Wv^T
        blk(params["out_proj_weight"].T),        # Wo^T
        blk(params["linear1_weight"].T),         # W1^T
    ], axis=1).astype(jnp.float32)               # (E, 5*BLK)

    w2t = jnp.pad(params["linear2_weight"].T,
                  ((0, BLK - F), (0, 0))).astype(jnp.float32)           # (BLK,E)

    def row(vec):
        return jnp.pad(vec, (0, BLK - vec.shape[0]))[None, :]

    bias = jnp.concatenate([
        row(ipb[:E] * scale), row(ipb[E:2 * E]), row(ipb[2 * E:]),
        row(params["out_proj_bias"]), row(params["linear1_bias"]),
        row(params["linear2_bias"]),
        row(params["norm2_weight"]), row(params["norm2_bias"]),
        row(params["norm3_weight"]), row(params["norm3_bias"]),
    ], axis=0).astype(jnp.float32)                                      # (10,BLK)
    return wa, w2t, bias


@functools.partial(jax.jit, static_argnames=("nhead",))
def transformer_cross_layer_forward(src, tgt, src_pos, tgt_pos,
                                    wa, w2t, bias, nhead):
    """Matches TransformerCrossLayer.forward (normalize_before=False).

    src, src_pos: (S, N, E); tgt, tgt_pos: (T, N, E) (seq-first layout).
    wa/w2t/bias: slabs from pack_params (packed once, reused every call).
    Returns (src_out, tgt_out) with the same shapes as src/tgt.
    """
    S, N, E = src.shape
    T = tgt.shape[0]
    Rs, Rt = S * N, T * N
    assert E % nhead == 0

    # Seq-first flatten is a free reshape (no transposes around the kernel).
    src2d = src.reshape(Rs, E)
    tgt2d = tgt.reshape(Rt, E)
    sp2d = (src_pos.reshape(Rs, E) if src_pos is not None
            else jnp.zeros_like(src2d))
    tp2d = (tgt_pos.reshape(Rt, E) if tgt_pos is not None
            else jnp.zeros_like(tgt2d))

    # 2-wide parallel grid (v7x megacore) when the halves stay sublane-tiled.
    nsplit = 2 if (Rs % 16 == 0 and Rt % 16 == 0) else 1
    hs, ht = Rs // nsplit, Rt // nsplit

    def full_spec(shape):
        return pl.BlockSpec(shape, lambda i: (0, 0))

    kernel = functools.partial(_cross_layer_kernel, nhead, N)
    osrc2d, otgt2d = pl.pallas_call(
        kernel,
        out_shape=(jax.ShapeDtypeStruct((Rs, E), jnp.float32),
                   jax.ShapeDtypeStruct((Rt, E), jnp.float32)),
        grid_spec=pltpu.PrefetchScalarGridSpec(
            num_scalar_prefetch=0,
            grid=(nsplit,),
            in_specs=[full_spec((Rs, E)), full_spec((Rt, E)),
                      full_spec((Rs, E)), full_spec((Rt, E)),
                      full_spec(wa.shape), full_spec(w2t.shape),
                      full_spec(bias.shape)],
            out_specs=[pl.BlockSpec((hs, E), lambda i: (i, 0)),
                       pl.BlockSpec((ht, E), lambda i: (i, 0))]),
        compiler_params=pltpu.CompilerParams(
            dimension_semantics=("parallel",)),
    )(src2d, tgt2d, sp2d, tp2d, wa, w2t, bias)

    return osrc2d.reshape(S, N, E), otgt2d.reshape(T, N, E)


def _reference_forward(src, tgt, src_pos, tgt_pos, p, nhead):
    """Pure-JAX reference of forward_post (dropout=0, relu, post-norm)."""
    E = src.shape[-1]
    dh = E // nhead
    hp = jax.lax.Precision.HIGHEST

    def mha(q_in, k_in, v_in):
        wq, wk, wv = (p["in_proj_weight"][:E], p["in_proj_weight"][E:2 * E],
                      p["in_proj_weight"][2 * E:])
        bq, bk, bv = (p["in_proj_bias"][:E], p["in_proj_bias"][E:2 * E],
                      p["in_proj_bias"][2 * E:])
        q = jnp.einsum("lne,fe->lnf", q_in, wq, precision=hp) + bq
        k = jnp.einsum("lne,fe->lnf", k_in, wk, precision=hp) + bk
        v = jnp.einsum("lne,fe->lnf", v_in, wv, precision=hp) + bv
        Lq, N = q.shape[0], q.shape[1]
        Lk = k.shape[0]
        q = q.reshape(Lq, N, nhead, dh) / math.sqrt(dh)
        k = k.reshape(Lk, N, nhead, dh)
        v = v.reshape(Lk, N, nhead, dh)
        s = jnp.einsum("qnhd,knhd->nhqk", q, k, precision=hp)
        a = jax.nn.softmax(s, axis=-1)
        o = jnp.einsum("nhqk,knhd->qnhd", a, v, precision=hp).reshape(Lq, N, E)
        return jnp.einsum("qne,fe->qnf", o, p["out_proj_weight"],
                          precision=hp) + p["out_proj_bias"]

    def ln(x, g, b):
        mu = x.mean(-1, keepdims=True)
        var = ((x - mu) ** 2).mean(-1, keepdims=True)
        return (x - mu) / jnp.sqrt(var + 1e-5) * g + b

    def ffn(x):
        h = jax.nn.relu(jnp.einsum("lne,fe->lnf", x, p["linear1_weight"],
                                   precision=hp) + p["linear1_bias"])
        return jnp.einsum("lnf,ef->lne", h, p["linear2_weight"],
                          precision=hp) + p["linear2_bias"]

    src_wp, tgt_wp = src + src_pos, tgt + tgt_pos
    src2 = mha(src_wp, tgt_wp, tgt)
    tgt2 = mha(tgt_wp, src_wp, src)
    s = ln(src + src2, p["norm2_weight"], p["norm2_bias"])
    t = ln(tgt + tgt2, p["norm2_weight"], p["norm2_bias"])
    s = ln(s + ffn(s), p["norm3_weight"], p["norm3_bias"])
    t = ln(t + ffn(t), p["norm3_weight"], p["norm3_bias"])
    return s, t


def init_params(key, d_model, nhead, dim_feedforward):
    """Synthetic parameters with the same shapes as the torch module."""
    E, F = d_model, dim_feedforward
    ks = jax.random.split(key, 6)

    def xavier(k, shape):
        fan_out, fan_in = shape
        a = math.sqrt(6.0 / (fan_in + fan_out))
        return jax.random.uniform(k, shape, jnp.float32, -a, a)

    return {
        "in_proj_weight": xavier(ks[0], (3 * E, E)),
        "in_proj_bias": 0.02 * jax.random.normal(ks[1], (3 * E,), jnp.float32),
        "out_proj_weight": xavier(ks[2], (E, E)),
        "out_proj_bias": jnp.zeros((E,), jnp.float32),
        "linear1_weight": xavier(ks[3], (F, E)),
        "linear1_bias": 0.02 * jax.random.normal(ks[4], (F,), jnp.float32),
        "linear2_weight": xavier(ks[5], (E, F)),
        "linear2_bias": jnp.zeros((E,), jnp.float32),
        "norm2_weight": jnp.ones((E,), jnp.float32),
        "norm2_bias": jnp.zeros((E,), jnp.float32),
        "norm3_weight": jnp.ones((E,), jnp.float32),
        "norm3_bias": jnp.zeros((E,), jnp.float32),
    }


if __name__ == "__main__":
    d_model, nhead, dim_ff = 32, 4, 64
    S, T, N = 8, 8, 2

    key = jax.random.PRNGKey(0)
    k1, k2, k3, k4, kp = jax.random.split(key, 5)
    src = jax.random.normal(k1, (S, N, d_model), jnp.float32)
    tgt = jax.random.normal(k2, (T, N, d_model), jnp.float32)
    src_pos = jax.random.normal(k3, (S, N, d_model), jnp.float32)
    tgt_pos = jax.random.normal(k4, (T, N, d_model), jnp.float32)
    params = init_params(kp, d_model, nhead, dim_ff)

    # One-time weight packing (hoisted out of the per-forward path).
    wa, w2t, bias = pack_params(params, nhead)
    wa, w2t, bias = jax.block_until_ready((wa, w2t, bias))

    out_src, out_tgt = transformer_cross_layer_forward(
        src, tgt, src_pos, tgt_pos, wa, w2t, bias, nhead=nhead)
    out_src = jax.block_until_ready(out_src)
    out_tgt = jax.block_until_ready(out_tgt)

    assert out_src.shape == (S, N, d_model)
    assert out_tgt.shape == (T, N, d_model)
    assert bool(jnp.all(jnp.isfinite(out_src)))
    assert bool(jnp.all(jnp.isfinite(out_tgt)))

    ref_src, ref_tgt = _reference_forward(src, tgt, src_pos, tgt_pos,
                                          params, nhead)
    err = max(float(jnp.max(jnp.abs(out_src - ref_src))),
              float(jnp.max(jnp.abs(out_tgt - ref_tgt))))
    # 5e-3 tolerance: pl.reciprocal(approx=True) in the softmax denominator
    # introduces ~1e-4 relative error on O(1) LayerNormed outputs.
    assert err < 5e-3, f"kernel mismatch vs pure-JAX reference: {err}"
    print("KERNEL_OK")
</pallas_src>

<mosaic_0001>
module attributes {stable_mosaic.version = 11 : i64} {
  func.func @_cross_layer_kernel(%arg0: i32, %arg1: memref<16x32xf32, #tpu.memory_space<vmem>>, %arg2: memref<16x32xf32, #tpu.memory_space<vmem>>, %arg3: memref<16x32xf32, #tpu.memory_space<vmem>>, %arg4: memref<16x32xf32, #tpu.memory_space<vmem>>, %arg5: memref<32x640xf32, #tpu.memory_space<vmem>>, %arg6: memref<128x32xf32, #tpu.memory_space<vmem>>, %arg7: memref<10x128xf32, #tpu.memory_space<vmem>>, %arg8: memref<8x32xf32, #tpu.memory_space<vmem>>, %arg9: memref<8x32xf32, #tpu.memory_space<vmem>>) attributes {dimension_semantics = [#tpu.dimension_semantics<parallel>], iteration_bounds = array<i64: 2>, scalar_prefetch = 0 : i64, scratch_operands = 0 : i64, tpu.core_type = #tpu.core_type<tc>, window_params = [{pipeline_mode = #tpu.pipeline_mode<synchronous>, transform_indices = @transform_0, window_bounds = array<i64: 16, 32>}, {pipeline_mode = #tpu.pipeline_mode<synchronous>, transform_indices = @transform_1, window_bounds = array<i64: 16, 32>}, {pipeline_mode = #tpu.pipeline_mode<synchronous>, transform_indices = @transform_2, window_bounds = array<i64: 16, 32>}, {pipeline_mode = #tpu.pipeline_mode<synchronous>, transform_indices = @transform_3, window_bounds = array<i64: 16, 32>}, {pipeline_mode = #tpu.pipeline_mode<synchronous>, transform_indices = @transform_4, window_bounds = array<i64: 32, 640>}, {pipeline_mode = #tpu.pipeline_mode<synchronous>, transform_indices = @transform_5, window_bounds = array<i64: 128, 32>}, {pipeline_mode = #tpu.pipeline_mode<synchronous>, transform_indices = @transform_6, window_bounds = array<i64: 10, 128>}, {transform_indices = @transform_7, window_bounds = array<i64: 8, 32>}, {transform_indices = @transform_8, window_bounds = array<i64: 8, 32>}]} {
    %c8_i32 = arith.constant 8 : i32
    %0 = arith.muli %arg0, %c8_i32 : i32
    %c8_i32_0 = arith.constant 8 : i32
    %1 = arith.muli %arg0, %c8_i32_0 : i32
    %2 = tpu.assume_multiple %0, 8 : i32
    %3 = tpu.assume_multiple %1, 8 : i32
    %c0 = arith.constant 0 : index
    %c0_1 = arith.constant 0 : index
    %4 = vector.load %arg5[%c0, %c0_1] : memref<32x640xf32, #tpu.memory_space<vmem>>, vector<32x640xf32>
    %c0_2 = arith.constant 0 : index
    %c0_3 = arith.constant 0 : index
    %5 = vector.load %arg6[%c0_2, %c0_3] : memref<128x32xf32, #tpu.memory_space<vmem>>, vector<128x32xf32>
    %c0_4 = arith.constant 0 : index
    %c0_5 = arith.constant 0 : index
    %6 = vector.load %arg7[%c0_4, %c0_5] : memref<10x128xf32, #tpu.memory_space<vmem>>, vector<10x128xf32>
    %c0_6 = arith.constant 0 : index
    %c0_7 = arith.constant 0 : index
    %7 = vector.load %arg1[%c0_6, %c0_7] : memref<16x32xf32, #tpu.memory_space<vmem>>, vector<16x32xf32>
    %c0_8 = arith.constant 0 : index
    %c0_9 = arith.constant 0 : index
    %8 = vector.load %arg2[%c0_8, %c0_9] : memref<16x32xf32, #tpu.memory_space<vmem>>, vector<16x32xf32>
    %9 = tpu.concatenate %7, %8 in 0 : vector<16x32xf32>, vector<16x32xf32> -> vector<32x32xf32>
    %c0_10 = arith.constant 0 : index
    %c0_11 = arith.constant 0 : index
    %10 = vector.load %arg3[%c0_10, %c0_11] : memref<16x32xf32, #tpu.memory_space<vmem>>, vector<16x32xf32>
    %11 = arith.addf %7, %10 : vector<16x32xf32>
    %c0_12 = arith.constant 0 : index
    %c0_13 = arith.constant 0 : index
    %12 = vector.load %arg4[%c0_12, %c0_13] : memref<16x32xf32, #tpu.memory_space<vmem>>, vector<16x32xf32>
    %13 = arith.addf %8, %12 : vector<16x32xf32>
    %14 = tpu.concatenate %11, %13 in 0 : vector<16x32xf32>, vector<16x32xf32> -> vector<32x32xf32>
    %15 = arith.index_cast %2 : i32 to index
    %c0_14 = arith.constant 0 : index
    %16 = vector.load %arg1[%15, %c0_14] : memref<16x32xf32, #tpu.memory_space<vmem>>, vector<8x32xf32>
    %17 = arith.index_cast %3 : i32 to index
    %c0_15 = arith.constant 0 : index
    %18 = vector.load %arg2[%17, %c0_15] : memref<16x32xf32, #tpu.memory_space<vmem>>, vector<8x32xf32>
    %19 = tpu.concatenate %16, %18 in 0 : vector<8x32xf32>, vector<8x32xf32> -> vector<16x32xf32>
    %20 = arith.index_cast %2 : i32 to index
    %c0_16 = arith.constant 0 : index
    %21 = vector.load %arg3[%20, %c0_16] : memref<16x32xf32, #tpu.memory_space<vmem>>, vector<8x32xf32>
    %22 = arith.index_cast %3 : i32 to index
    %c0_17 = arith.constant 0 : index
    %23 = vector.load %arg4[%22, %c0_17] : memref<16x32xf32, #tpu.memory_space<vmem>>, vector<8x32xf32>
    %24 = tpu.concatenate %21, %23 in 0 : vector<8x32xf32>, vector<8x32xf32> -> vector<16x32xf32>
    %25 = arith.addf %19, %24 : vector<16x32xf32>
    %26 = vector.extract_strided_slice %4 {offsets = [0, 0], sizes = [32, 128], strides = [1, 1]} : vector<32x640xf32> to vector<32x128xf32>
    %cst = arith.constant dense<0.000000e+00> : vector<16x128xf32>
    %27 = tpu.matmul %25, %26, %cst {dimension_numbers = #tpu.dot_dimension_numbers<[1], [0], [0], [1], [0, 0, 1, 1], [], []>} : vector<16x32xf32>, vector<32x128xf32>, vector<16x128xf32> -> vector<16x128xf32>
    %28 = vector.extract_strided_slice %6 {offsets = [0, 0], sizes = [1, 128], strides = [1, 1]} : vector<10x128xf32> to vector<1x128xf32>
    %29 = vector.broadcast %28 : vector<1x128xf32> to vector<16x128xf32>
    %30 = arith.addf %27, %29 : vector<16x128xf32>
    %31 = vector.extract_strided_slice %4 {offsets = [0, 128], sizes = [32, 128], strides = [1, 1]} : vector<32x640xf32> to vector<32x128xf32>
    %cst_18 = arith.constant dense<0.000000e+00> : vector<32x128xf32>
    %32 = tpu.matmul %14, %31, %cst_18 {dimension_numbers = #tpu.dot_dimension_numbers<[1], [0], [0], [1], [0, 0, 1, 1], [], []>} : vector<32x32xf32>, vector<32x128xf32>, vector<32x128xf32> -> vector<32x128xf32>
    %33 = vector.extract_strided_slice %6 {offsets = [1, 0], sizes = [1, 128], strides = [1, 1]} : vector<10x128xf32> to vector<1x128xf32>
    %34 = vector.broadcast %33 : vector<1x128xf32> to vector<32x128xf32>
    %35 = arith.addf %32, %34 : vector<32x128xf32>
    %36 = vector.extract_strided_slice %4 {offsets = [0, 256], sizes = [32, 128], strides = [1, 1]} : vector<32x640xf32> to vector<32x128xf32>
    %cst_19 = arith.constant dense<0.000000e+00> : vector<32x128xf32>
    %37 = tpu.matmul %9, %36, %cst_19 {dimension_numbers = #tpu.dot_dimension_numbers<[1], [0], [0], [1], [0, 0, 1, 1], [], []>} : vector<32x32xf32>, vector<32x128xf32>, vector<32x128xf32> -> vector<32x128xf32>
    %38 = vector.extract_strided_slice %6 {offsets = [2, 0], sizes = [1, 128], strides = [1, 1]} : vector<10x128xf32> to vector<1x128xf32>
    %39 = vector.broadcast %38 : vector<1x128xf32> to vector<32x128xf32>
    %40 = arith.addf %37, %39 : vector<32x128xf32>
    %41 = tpu.iota {dimensions = array<i32: 0>} : vector<16x32xi32>
    %42 = tpu.iota {dimensions = array<i32: 1>} : vector<16x32xi32>
    %c8_i32_20 = arith.constant 8 : i32
    %43 = vector.broadcast %c8_i32_20 : i32 to vector<16x32xi32>
    %44 = arith.cmpi slt, %41, %43 : vector<16x32xi32>
    %45 = vector.broadcast %2 : i32 to vector<16x32xi32>
    %46 = arith.addi %41, %45 : vector<16x32xi32>
    %c2_i32 = arith.constant 2 : i32
    %c0_i32 = arith.constant 0 : i32
    %47 = arith.cmpi eq, %c2_i32, %c0_i32 : i32
    %c1_i32 = arith.constant 1 : i32
    %48 = arith.select %47, %c1_i32, %c2_i32 : i32
    %49 = vector.broadcast %48 : i32 to vector<16x32xi32>
    %50 = arith.remsi %46, %49 : vector<16x32xi32>
    %c0_i32_21 = arith.constant 0 : i32
    %51 = vector.broadcast %c0_i32_21 : i32 to vector<16x32xi32>
    %52 = arith.cmpi ne, %50, %51 : vector<16x32xi32>
    %c0_i32_22 = arith.constant 0 : i32
    %53 = vector.broadcast %c0_i32_22 : i32 to vector<16x32xi32>
    %54 = arith.cmpi slt, %50, %53 : vector<16x32xi32>
    %c0_i32_23 = arith.constant 0 : i32
    %55 = arith.cmpi slt, %48, %c0_i32_23 : i32
    %56 = vector.broadcast %55 : i1 to vector<16x32xi1>
    %57 = vector.broadcast %56 : vector<16x32xi1> to vector<16x32xi1>
    %58 = arith.xori %54, %57 : vector<16x32xi1>
    %59 = arith.andi %58, %52 : vector<16x32xi1>
    %60 = vector.broadcast %48 : i32 to vector<16x32xi32>
    %61 = arith.addi %50, %60 : vector<16x32xi32>
    %62 = arith.select %59, %61, %50 : vector<16x32xi1>, vector<16x32xi32>
    %c8_i32_24 = arith.constant 8 : i32
    %63 = vector.broadcast %c8_i32_24 : i32 to vector<16x32xi32>
    %64 = arith.subi %41, %63 : vector<16x32xi32>
    %65 = vector.broadcast %3 : i32 to vector<16x32xi32>
    %66 = arith.addi %64, %65 : vector<16x32xi32>
    %c2_i32_25 = arith.constant 2 : i32
    %c0_i32_26 = arith.constant 0 : i32
    %67 = arith.cmpi eq, %c2_i32_25, %c0_i32_26 : i32
    %c1_i32_27 = arith.constant 1 : i32
    %68 = arith.select %67, %c1_i32_27, %c2_i32_25 : i32
    %69 = vector.broadcast %68 : i32 to vector<16x32xi32>
    %70 = arith.remsi %66, %69 : vector<16x32xi32>
    %c0_i32_28 = arith.constant 0 : i32
    %71 = vector.broadcast %c0_i32_28 : i32 to vector<16x32xi32>
    %72 = arith.cmpi ne, %70, %71 : vector<16x32xi32>
    %c0_i32_29 = arith.constant 0 : i32
    %73 = vector.broadcast %c0_i32_29 : i32 to vector<16x32xi32>
    %74 = arith.cmpi slt, %70, %73 : vector<16x32xi32>
    %c0_i32_30 = arith.constant 0 : i32
    %75 = arith.cmpi slt, %68, %c0_i32_30 : i32
    %76 = vector.broadcast %75 : i1 to vector<16x32xi1>
    %77 = vector.broadcast %76 : vector<16x32xi1> to vector<16x32xi1>
    %78 = arith.xori %74, %77 : vector<16x32xi1>
    %79 = arith.andi %78, %72 : vector<16x32xi1>
    %80 = vector.broadcast %68 : i32 to vector<16x32xi32>
    %81 = arith.addi %70, %80 : vector<16x32xi32>
    %82 = arith.select %79, %81, %70 : vector<16x32xi1>, vector<16x32xi32>
    %83 = arith.select %44, %62, %82 : vector<16x32xi1>, vector<16x32xi32>
    %c16_i32 = arith.constant 16 : i32
    %84 = vector.broadcast %c16_i32 : i32 to vector<16x32xi32>
    %85 = arith.cmpi slt, %42, %84 : vector<16x32xi32>
    %c2_i32_31 = arith.constant 2 : i32
    %c0_i32_32 = arith.constant 0 : i32
    %86 = arith.cmpi eq, %c2_i32_31, %c0_i32_32 : i32
    %c1_i32_33 = arith.constant 1 : i32
    %87 = arith.select %86, %c1_i32_33, %c2_i32_31 : i32
    %88 = vector.broadcast %87 : i32 to vector<16x32xi32>
    %89 = arith.remsi %42, %88 : vector<16x32xi32>
    %c0_i32_34 = arith.constant 0 : i32
    %90 = vector.broadcast %c0_i32_34 : i32 to vector<16x32xi32>
    %91 = arith.cmpi ne, %89, %90 : vector<16x32xi32>
    %c0_i32_35 = arith.constant 0 : i32
    %92 = vector.broadcast %c0_i32_35 : i32 to vector<16x32xi32>
    %93 = arith.cmpi slt, %89, %92 : vector<16x32xi32>
    %c0_i32_36 = arith.constant 0 : i32
    %94 = arith.cmpi slt, %87, %c0_i32_36 : i32
    %95 = vector.broadcast %94 : i1 to vector<16x32xi1>
    %96 = vector.broadcast %95 : vector<16x32xi1> to vector<16x32xi1>
    %97 = arith.xori %93, %96 : vector<16x32xi1>
    %98 = arith.andi %97, %91 : vector<16x32xi1>
    %99 = vector.broadcast %87 : i32 to vector<16x32xi32>
    %100 = arith.addi %89, %99 : vector<16x32xi32>
    %101 = arith.select %98, %100, %89 : vector<16x32xi1>, vector<16x32xi32>
    %c16_i32_37 = arith.constant 16 : i32
    %102 = vector.broadcast %c16_i32_37 : i32 to vector<16x32xi32>
    %103 = arith.subi %42, %102 : vector<16x32xi32>
    %c2_i32_38 = arith.constant 2 : i32
    %c0_i32_39 = arith.constant 0 : i32
    %104 = arith.cmpi eq, %c2_i32_38, %c0_i32_39 : i32
    %c1_i32_40 = arith.constant 1 : i32
    %105 = arith.select %104, %c1_i32_40, %c2_i32_38 : i32
    %106 = vector.broadcast %105 : i32 to vector<16x32xi32>
    %107 = arith.remsi %103, %106 : vector<16x32xi32>
    %c0_i32_41 = arith.constant 0 : i32
    %108 = vector.broadcast %c0_i32_41 : i32 to vector<16x32xi32>
    %109 = arith.cmpi ne, %107, %108 : vector<16x32xi32>
    %c0_i32_42 = arith.constant 0 : i32
    %110 = vector.broadcast %c0_i32_42 : i32 to vector<16x32xi32>
    %111 = arith.cmpi slt, %107, %110 : vector<16x32xi32>
    %c0_i32_43 = arith.constant 0 : i32
    %112 = arith.cmpi slt, %105, %c0_i32_43 : i32
    %113 = vector.broadcast %112 : i1 to vector<16x32xi1>
    %114 = vector.broadcast %113 : vector<16x32xi1> to vector<16x32xi1>
    %115 = arith.xori %111, %114 : vector<16x32xi1>
    %116 = arith.andi %115, %109 : vector<16x32xi1>
    %117 = vector.broadcast %105 : i32 to vector<16x32xi32>
    %118 = arith.addi %107, %117 : vector<16x32xi32>
    %119 = arith.select %116, %118, %107 : vector<16x32xi1>, vector<16x32xi32>
    %120 = arith.select %85, %101, %119 : vector<16x32xi1>, vector<16x32xi32>
    %121 = arith.cmpi eq, %83, %120 : vector<16x32xi32>
    %122 = arith.xori %44, %85 : vector<16x32xi1>
    %123 = arith.andi %121, %122 : vector<16x32xi1>
    %cst_44 = arith.constant 0.000000e+00 : f32
    %cst_45 = arith.constant -1.000000e+30 : f32
    %124 = vector.broadcast %cst_44 : f32 to vector<16x32xf32>
    %125 = vector.broadcast %cst_45 : f32 to vector<16x32xf32>
    %126 = arith.select %123, %124, %125 : vector<16x32xi1>, vector<16x32xf32>
    %127 = vector.extract_strided_slice %30 {offsets = [0, 0], sizes = [16, 8], strides = [1, 1]} : vector<16x128xf32> to vector<16x8xf32>
    %128 = vector.extract_strided_slice %35 {offsets = [0, 0], sizes = [32, 8], strides = [1, 1]} : vector<32x128xf32> to vector<32x8xf32>
    %cst_46 = arith.constant dense<0.000000e+00> : vector<16x32xf32>
    %129 = tpu.matmul %127, %128, %cst_46 {dimension_numbers = #tpu.dot_dimension_numbers<[1], [1], [0], [0], [0, 0, 1, 0], [], []>} : vector<16x8xf32>, vector<32x8xf32>, vector<16x32xf32> -> vector<16x32xf32>
    %130 = vector.extract_strided_slice %30 {offsets = [0, 8], sizes = [16, 8], strides = [1, 1]} : vector<16x128xf32> to vector<16x8xf32>
    %131 = vector.extract_strided_slice %35 {offsets = [0, 8], sizes = [32, 8], strides = [1, 1]} : vector<32x128xf32> to vector<32x8xf32>
    %cst_47 = arith.constant dense<0.000000e+00> : vector<16x32xf32>
    %132 = tpu.matmul %130, %131, %cst_47 {dimension_numbers = #tpu.dot_dimension_numbers<[1], [1], [0], [0], [0, 0, 1, 0], [], []>} : vector<16x8xf32>, vector<32x8xf32>, vector<16x32xf32> -> vector<16x32xf32>
    %133 = vector.extract_strided_slice %30 {offsets = [0, 16], sizes = [16, 8], strides = [1, 1]} : vector<16x128xf32> to vector<16x8xf32>
    %134 = vector.extract_strided_slice %35 {offsets = [0, 16], sizes = [32, 8], strides = [1, 1]} : vector<32x128xf32> to vector<32x8xf32>
    %cst_48 = arith.constant dense<0.000000e+00> : vector<16x32xf32>
    %135 = tpu.matmul %133, %134, %cst_48 {dimension_numbers = #tpu.dot_dimension_numbers<[1], [1], [0], [0], [0, 0, 1, 0], [], []>} : vector<16x8xf32>, vector<32x8xf32>, vector<16x32xf32> -> vector<16x32xf32>
    %136 = vector.extract_strided_slice %30 {offsets = [0, 24], sizes = [16, 8], strides = [1, 1]} : vector<16x128xf32> to vector<16x8xf32>
    %137 = vector.extract_strided_slice %35 {offsets = [0, 24], sizes = [32, 8], strides = [1, 1]} : vector<32x128xf32> to vector<32x8xf32>
    %cst_49 = arith.constant dense<0.000000e+00> : vector<16x32xf32>
    %138 = tpu.matmul %136, %137, %cst_49 {dimension_numbers = #tpu.dot_dimension_numbers<[1], [1], [0], [0], [0, 0, 1, 0], [], []>} : vector<16x8xf32>, vector<32x8xf32>, vector<16x32xf32> -> vector<16x32xf32>
    %139 = vector.shape_cast %129 : vector<16x32xf32> to vector<1x16x32xf32>
    %140 = vector.shape_cast %132 : vector<16x32xf32> to vector<1x16x32xf32>
    %141 = vector.shape_cast %135 : vector<16x32xf32> to vector<1x16x32xf32>
    %142 = vector.shape_cast %138 : vector<16x32xf32> to vector<1x16x32xf32>
    %143 = tpu.concatenate %139, %140, %141, %142 in 0 : vector<1x16x32xf32>, vector<1x16x32xf32>, vector<1x16x32xf32>, vector<1x16x32xf32> -> vector<4x16x32xf32>
    %144 = vector.shape_cast %126 : vector<16x32xf32> to vector<1x16x32xf32>
    %145 = vector.broadcast %144 : vector<1x16x32xf32> to vector<4x16x32xf32>
    %146 = arith.addf %143, %145 : vector<4x16x32xf32>
    %cst_50 = arith.constant dense<0xFF800000> : vector<4x16xf32>
    %147 = vector.multi_reduction <maximumf>, %146, %cst_50 [2] : vector<4x16x32xf32> to vector<4x16xf32>
    %148 = vector.shape_cast %147 : vector<4x16xf32> to vector<4x16x1xf32>
    %149 = vector.broadcast %148 : vector<4x16x1xf32> to vector<4x16x32xf32>
    %150 = arith.subf %146, %149 : vector<4x16x32xf32>
    %151 = math.exp %150 : vector<4x16x32xf32>
    %cst_51 = arith.constant dense<0.000000e+00> : vector<4x16xf32>
    %152 = vector.multi_reduction <add>, %151, %cst_51 [2] : vector<4x16x32xf32> to vector<4x16xf32>
    %153 = vector.shape_cast %152 : vector<4x16xf32> to vector<4x16x1xf32>
    %154 = tpu.reciprocal %153 {approx = true} : vector<4x16x1xf32> -> vector<4x16x1xf32>
    %155 = vector.broadcast %154 : vector<4x16x1xf32> to vector<4x16x32xf32>
    %156 = arith.mulf %151, %155 : vector<4x16x32xf32>
    %157 = vector.extract_strided_slice %156 {offsets = [0, 0, 0], sizes = [1, 16, 32], strides = [1, 1, 1]} : vector<4x16x32xf32> to vector<1x16x32xf32>
    %158 = vector.shape_cast %157 : vector<1x16x32xf32> to vector<16x32xf32>
    %159 = vector.extract_strided_slice %40 {offsets = [0, 0], sizes = [32, 8], strides = [1, 1]} : vector<32x128xf32> to vector<32x8xf32>
    %cst_52 = arith.constant dense<0.000000e+00> : vector<16x8xf32>
    %160 = tpu.matmul %158, %159, %cst_52 {dimension_numbers = #tpu.dot_dimension_numbers<[1], [0], [0], [1], [0, 0, 1, 1], [], []>} : vector<16x32xf32>, vector<32x8xf32>, vector<16x8xf32> -> vector<16x8xf32>
    %161 = vector.extract_strided_slice %156 {offsets = [1, 0, 0], sizes = [1, 16, 32], strides = [1, 1, 1]} : vector<4x16x32xf32> to vector<1x16x32xf32>
    %162 = vector.shape_cast %161 : vector<1x16x32xf32> to vector<16x32xf32>
    %163 = vector.extract_strided_slice %40 {offsets = [0, 8], sizes = [32, 8], strides = [1, 1]} : vector<32x128xf32> to vector<32x8xf32>
    %cst_53 = arith.constant dense<0.000000e+00> : vector<16x8xf32>
    %164 = tpu.matmul %162, %163, %cst_53 {dimension_numbers = #tpu.dot_dimension_numbers<[1], [0], [0], [1], [0, 0, 1, 1], [], []>} : vector<16x32xf32>, vector<32x8xf32>, vector<16x8xf32> -> vector<16x8xf32>
    %165 = vector.extract_strided_slice %156 {offsets = [2, 0, 0], sizes = [1, 16, 32], strides = [1, 1, 1]} : vector<4x16x32xf32> to vector<1x16x32xf32>
    %166 = vector.shape_cast %165 : vector<1x16x32xf32> to vector<16x32xf32>
    %167 = vector.extract_strided_slice %40 {offsets = [0, 16], sizes = [32, 8], strides = [1, 1]} : vector<32x128xf32> to vector<32x8xf32>
    %cst_54 = arith.constant dense<0.000000e+00> : vector<16x8xf32>
    %168 = tpu.matmul %166, %167, %cst_54 {dimension_numbers = #tpu.dot_dimension_numbers<[1], [0], [0], [1], [0, 0, 1, 1], [], []>} : vector<16x32xf32>, vector<32x8xf32>, vector<16x8xf32> -> vector<16x8xf32>
    %169 = vector.extract_strided_slice %156 {offsets = [3, 0, 0], sizes = [1, 16, 32], strides = [1, 1, 1]} : vector<4x16x32xf32> to vector<1x16x32xf32>
    %170 = vector.shape_cast %169 : vector<1x16x32xf32> to vector<16x32xf32>
    %171 = vector.extract_strided_slice %40 {offsets = [0, 24], sizes = [32, 8], strides = [1, 1]} : vector<32x128xf32> to vector<32x8xf32>
    %cst_55 = arith.constant dense<0.000000e+00> : vector<16x8xf32>
    %172 = tpu.matmul %170, %171, %cst_55 {dimension_numbers = #tpu.dot_dimension_numbers<[1], [0], [0], [1], [0, 0, 1, 1], [], []>} : vector<16x32xf32>, vector<32x8xf32>, vector<16x8xf32> -> vector<16x8xf32>
    %173 = tpu.concatenate %160, %164, %168, %172 in 1 : vector<16x8xf32>, vector<16x8xf32>, vector<16x8xf32>, vector<16x8xf32> -> vector<16x32xf32>
    %174 = vector.extract_strided_slice %4 {offsets = [0, 384], sizes = [32, 32], strides = [1, 1]} : vector<32x640xf32> to vector<32x32xf32>
    %cst_56 = arith.constant dense<0.000000e+00> : vector<16x32xf32>
    %175 = tpu.matmul %173, %174, %cst_56 {dimension_numbers = #tpu.dot_dimension_numbers<[1], [0], [0], [1], [0, 0, 1, 1], [], []>} : vector<16x32xf32>, vector<32x32xf32>, vector<16x32xf32> -> vector<16x32xf32>
    %176 = vector.extract_strided_slice %6 {offsets = [3, 0], sizes = [1, 32], strides = [1, 1]} : vector<10x128xf32> to vector<1x32xf32>
    %177 = vector.broadcast %176 : vector<1x32xf32> to vector<16x32xf32>
    %178 = arith.addf %175, %177 : vector<16x32xf32>
    %179 = arith.addf %19, %178 : vector<16x32xf32>
    %180 = vector.extract_strided_slice %6 {offsets = [6, 0], sizes = [1, 32], strides = [1, 1]} : vector<10x128xf32> to vector<1x32xf32>
    %181 = vector.extract_strided_slice %6 {offsets = [7, 0], sizes = [1, 32], strides = [1, 1]} : vector<10x128xf32> to vector<1x32xf32>
    %cst_57 = arith.constant dense<0.000000e+00> : vector<16xf32>
    %182 = vector.multi_reduction <add>, %179, %cst_57 [1] : vector<16x32xf32> to vector<16xf32>
    %183 = vector.shape_cast %182 : vector<16xf32> to vector<16x1xf32>
    %cst_58 = arith.constant 3.200000e+01 : f32
    %184 = vector.broadcast %cst_58 : f32 to vector<16x1xf32>
    %185 = arith.divf %183, %184 : vector<16x1xf32>
    %186 = vector.broadcast %185 : vector<16x1xf32> to vector<16x32xf32>
    %187 = arith.subf %179, %186 : vector<16x32xf32>
    %188 = arith.mulf %187, %187 : vector<16x32xf32>
    %cst_59 = arith.constant dense<0.000000e+00> : vector<16xf32>
    %189 = vector.multi_reduction <add>, %188, %cst_59 [1] : vector<16x32xf32> to vector<16xf32>
    %190 = vector.shape_cast %189 : vector<16xf32> to vector<16x1xf32>
    %cst_60 = arith.constant 3.200000e+01 : f32
    %191 = vector.broadcast %cst_60 : f32 to vector<16x1xf32>
    %192 = arith.divf %190, %191 : vector<16x1xf32>
    %cst_61 = arith.constant 9.99999974E-6 : f32
    %193 = vector.broadcast %cst_61 : f32 to vector<16x1xf32>
    %194 = arith.addf %192, %193 : vector<16x1xf32>
    %195 = math.rsqrt %194 : vector<16x1xf32>
    %196 = vector.broadcast %195 : vector<16x1xf32> to vector<16x32xf32>
    %197 = arith.mulf %187, %196 : vector<16x32xf32>
    %198 = vector.broadcast %180 : vector<1x32xf32> to vector<16x32xf32>
    %199 = arith.mulf %197, %198 : vector<16x32xf32>
    %200 = vector.broadcast %181 : vector<1x32xf32> to vector<16x32xf32>
    %201 = arith.addf %199, %200 : vector<16x32xf32>
    %202 = vector.extract_strided_slice %4 {offsets = [0, 512], sizes = [32, 128], strides = [1, 1]} : vector<32x640xf32> to vector<32x128xf32>
    %cst_62 = arith.constant dense<0.000000e+00> : vector<16x128xf32>
    %203 = tpu.matmul %201, %202, %cst_62 {dimension_numbers = #tpu.dot_dimension_numbers<[1], [0], [0], [1], [0, 0, 1, 1], [], []>} : vector<16x32xf32>, vector<32x128xf32>, vector<16x128xf32> -> vector<16x128xf32>
    %204 = vector.extract_strided_slice %6 {offsets = [4, 0], sizes = [1, 128], strides = [1, 1]} : vector<10x128xf32> to vector<1x128xf32>
    %205 = vector.broadcast %204 : vector<1x128xf32> to vector<16x128xf32>
    %206 = arith.addf %203, %205 : vector<16x128xf32>
    %cst_63 = arith.constant 0.000000e+00 : f32
    %207 = vector.broadcast %cst_63 : f32 to vector<16x128xf32>
    %208 = arith.maximumf %206, %207 : vector<16x128xf32>
    %cst_64 = arith.constant dense<0.000000e+00> : vector<16x32xf32>
    %209 = tpu.matmul %208, %5, %cst_64 {dimension_numbers = #tpu.dot_dimension_numbers<[1], [0], [0], [1], [0, 0, 1, 1], [], []>} : vector<16x128xf32>, vector<128x32xf32>, vector<16x32xf32> -> vector<16x32xf32>
    %210 = vector.extract_strided_slice %6 {offsets = [5, 0], sizes = [1, 32], strides = [1, 1]} : vector<10x128xf32> to vector<1x32xf32>
    %211 = vector.broadcast %210 : vector<1x32xf32> to vector<16x32xf32>
    %212 = arith.addf %209, %211 : vector<16x32xf32>
    %213 = arith.addf %201, %212 : vector<16x32xf32>
    %214 = vector.extract_strided_slice %6 {offsets = [8, 0], sizes = [1, 32], strides = [1, 1]} : vector<10x128xf32> to vector<1x32xf32>
    %215 = vector.extract_strided_slice %6 {offsets = [9, 0], sizes = [1, 32], strides = [1, 1]} : vector<10x128xf32> to vector<1x32xf32>
    %cst_65 = arith.constant dense<0.000000e+00> : vector<16xf32>
    %216 = vector.multi_reduction <add>, %213, %cst_65 [1] : vector<16x32xf32> to vector<16xf32>
    %217 = vector.shape_cast %216 : vector<16xf32> to vector<16x1xf32>
    %cst_66 = arith.constant 3.200000e+01 : f32
    %218 = vector.broadcast %cst_66 : f32 to vector<16x1xf32>
    %219 = arith.divf %217, %218 : vector<16x1xf32>
    %220 = vector.broadcast %219 : vector<16x1xf32> to vector<16x32xf32>
    %221 = arith.subf %213, %220 : vector<16x32xf32>
    %222 = arith.mulf %221, %221 : vector<16x32xf32>
    %cst_67 = arith.constant dense<0.000000e+00> : vector<16xf32>
    %223 = vector.multi_reduction <add>, %222, %cst_67 [1] : vector<16x32xf32> to vector<16xf32>
    %224 = vector.shape_cast %223 : vector<16xf32> to vector<16x1xf32>
    %cst_68 = arith.constant 3.200000e+01 : f32
    %225 = vector.broadcast %cst_68 : f32 to vector<16x1xf32>
    %226 = arith.divf %224, %225 : vector<16x1xf32>
    %cst_69 = arith.constant 9.99999974E-6 : f32
    %227 = vector.broadcast %cst_69 : f32 to vector<16x1xf32>
    %228 = arith.addf %226, %227 : vector<16x1xf32>
    %229 = math.rsqrt %228 : vector<16x1xf32>
    %230 = vector.broadcast %229 : vector<16x1xf32> to vector<16x32xf32>
    %231 = arith.mulf %221, %230 : vector<16x32xf32>
    %232 = vector.broadcast %214 : vector<1x32xf32> to vector<16x32xf32>
    %233 = arith.mulf %231, %232 : vector<16x32xf32>
    %234 = vector.broadcast %215 : vector<1x32xf32> to vector<16x32xf32>
    %235 = arith.addf %233, %234 : vector<16x32xf32>
    %236 = vector.extract_strided_slice %235 {offsets = [0, 0], sizes = [8, 32], strides = [1, 1]} : vector<16x32xf32> to vector<8x32xf32>
    %c0_70 = arith.constant 0 : index
    %c0_71 = arith.constant 0 : index
    %237 = vector.load %arg8[%c0_70, %c0_71] : memref<8x32xf32, #tpu.memory_space<vmem>>, vector<8x32xf32>
    tpu.vector_store %arg8[%c0_70, %c0_71], %236 {strides = array<i32>} : memref<8x32xf32, #tpu.memory_space<vmem>>, vector<8x32xf32>,
    %238 = vector.extract_strided_slice %235 {offsets = [8, 0], sizes = [8, 32], strides = [1, 1]} : vector<16x32xf32> to vector<8x32xf32>
    %c0_72 = arith.constant 0 : index
    %c0_73 = arith.constant 0 : index
    %239 = vector.load %arg9[%c0_72, %c0_73] : memref<8x32xf32, #tpu.memory_space<vmem>>, vector<8x32xf32>
    tpu.vector_store %arg9[%c0_72, %c0_73], %238 {strides = array<i32>} : memref<8x32xf32, #tpu.memory_space<vmem>>, vector<8x32xf32>,
    return
  }
  func.func @transform_0(%arg0: i32) -> (i32, i32) {
    %c0_i32 = arith.constant 0 : i32
    %c0_i32_0 = arith.constant 0 : i32
    %c0_i32_1 = arith.constant 0 : i32
    return %c0_i32, %c0_i32_0 : i32, i32
  }
  func.func @transform_1(%arg0: i32) -> (i32, i32) {
    %c0_i32 = arith.constant 0 : i32
    %c0_i32_0 = arith.constant 0 : i32
    %c0_i32_1 = arith.constant 0 : i32
    return %c0_i32, %c0_i32_0 : i32, i32
  }
  func.func @transform_2(%arg0: i32) -> (i32, i32) {
    %c0_i32 = arith.constant 0 : i32
    %c0_i32_0 = arith.constant 0 : i32
    %c0_i32_1 = arith.constant 0 : i32
    return %c0_i32, %c0_i32_0 : i32, i32
  }
  func.func @transform_3(%arg0: i32) -> (i32, i32) {
    %c0_i32 = arith.constant 0 : i32
    %c0_i32_0 = arith.constant 0 : i32
    %c0_i32_1 = arith.constant 0 : i32
    return %c0_i32, %c0_i32_0 : i32, i32
  }
  func.func @transform_4(%arg0: i32) -> (i32, i32) {
    %c0_i32 = arith.constant 0 : i32
    %c0_i32_0 = arith.constant 0 : i32
    %c0_i32_1 = arith.constant 0 : i32
    return %c0_i32, %c0_i32_0 : i32, i32
  }
  func.func @transform_5(%arg0: i32) -> (i32, i32) {
    %c0_i32 = arith.constant 0 : i32
    %c0_i32_0 = arith.constant 0 : i32
    %c0_i32_1 = arith.constant 0 : i32
    return %c0_i32, %c0_i32_0 : i32, i32
  }
  func.func @transform_6(%arg0: i32) -> (i32, i32) {
    %c0_i32 = arith.constant 0 : i32
    %c0_i32_0 = arith.constant 0 : i32
    %c0_i32_1 = arith.constant 0 : i32
    return %c0_i32, %c0_i32_0 : i32, i32
  }
  func.func @transform_7(%arg0: i32) -> (i32, i32) {
    %c0_i32 = arith.constant 0 : i32
    %c0_i32_0 = arith.constant 0 : i32
    return %arg0, %c0_i32 : i32, i32
  }
  func.func @transform_8(%arg0: i32) -> (i32, i32) {
    %c0_i32 = arith.constant 0 : i32
    %c0_i32_0 = arith.constant 0 : i32
    return %arg0, %c0_i32 : i32, i32
  }
}

</mosaic_0001>

<bundles_post_ra>
// kernel: transformer_cross_layer_forward.1
= control target key start
LH: loop header
LB: loop body
LE: loop exit
PB: predicated region body
PF: predicated region fallthrough
CT: control target
= control target key end

     0   :  { %s3820_s0 = inlined_call_operand.hbm [shape: f32[16,32], index: 0, kind: input, shape index: {}]   ;;  %s3821_s1 = inlined_call_operand.hbm [shape: f32[16,32], index: 1, kind: input, shape index: {}]   ;;  %s3822_s2 = inlined_call_operand.hbm [shape: f32[16,32], index: 2, kind: input, shape index: {}]   ;;  %s3823_s3 = inlined_call_operand.hbm [shape: f32[16,32], index: 3, kind: input, shape index: {}]   ;;  %s3824_s4 = inlined_call_operand.vmem [shape: f32[32,640], index: 4, kind: input, shape index: {}]   ;;  %s3825_s5 = inlined_call_operand.vmem [shape: f32[128,32], index: 5, kind: input, shape index: {}]   ;;  %s3826_s6 = inlined_call_operand.hbm [shape: f32[10,128], index: 6, kind: input, shape index: {}]   ;;  %s3827_s7 = inlined_call_operand.hbm [shape: f32[16,32], index: 7, kind: output, shape index: {0}]   ;;  %s3828_s8 = inlined_call_operand.hbm [shape: f32[16,32], index: 8, kind: output, shape index: {1}]  }
   0x1   :  { %3836 = sst [smem:[#allocation23_spill]] %s3821_s1 }
   0x2   :  { %14 = vsyncpa [#allocation3], 0 }
   0x3   :  { %15 = vsyncpa [#allocation6], 0 }
   0x4   :  { %16 = vsyncpa [#allocation9], 0 }
   0x5   :  { %17 = vsyncpa [#allocation4], 0 }
   0x6   :  { %19 = vsyncpa [#allocation4 + $0x1], 0 }
   0x7   :  { %20 = vsyncpa [#allocation13], 0 }
   0x8   :  { %22 = vsyncpa [#allocation13 + $0x1], 0  ;;  %s3213_s27 = smov 0   ;;  %s3215_s28 = smov 0  }
   0x9   :  { %s3217_s29 = smov 0   ;;  %s3219_s30 = smov 0  }
   0xa LB: > { %3837 = sst [smem:[#allocation19_spill]] %s3145_s29  ;;  %s3234_s9 = sadd.s32 4294967295, %s3149_s30   ;;  %s3149_s30 = sphi %s3219_s30, %s3859_s30   ;;  %s3145_s29 = sphi %s3217_s29, %s3861_s29   ;;  %s3141_s28 = sphi %s3215_s28, %s3863_s28   ;;  %s3137_s27 = sphi %s3213_s27, %s3862_s27  }
   0xb   : > { %s2188_s10 = sadd.s32 4294967294, %s3149_s30   ;;  %s3238_s11 = sadd.s32 1, %s3149_s30  }
   0xc   : > { %3838 = sst [smem:[#allocation20_spill]] %s3238_s11  ;;  %s182_s12 = sadd.s32 1, %s3145_s29 }
   0xd   : > { %s179_s13 = ssub.s32 %s3149_s30, %s3238_s11  ;;  %p192_p0 = scmp.ne.s32.totalorder %s3145_s29, %s3141_s28 }
   0xe   : > { %p180_p1 = scmp.eq.s32.totalorder %s179_s13, 0  ;;  %p193_p2 = scmp.eq.s32.totalorder %s3234_s9, 1 }
   0xf   : > { %p198_p3 = scmp.ne.s32.totalorder %s3141_s28, %s3137_s27  ;;  %p199_p4 = scmp.eq.s32.totalorder %s2188_s10, 1 }
  0x10   : > { %s3249_s14 = scalar_select %p180_p1, %s3145_s29, %s182_s12  }
  0x11   : > { %p3251_p5 = por %p193_p2, %p192_p0  ;;  %p3255_p6 = por %p199_p4, %p198_p3 }
  0x12   : > { %3839 = sst [smem:[#allocation21_spill]] %s3249_s14  ;;  %p2189_p7 = scmp.ge.s32.totalorder %s3149_s30, 1 }
  0x13   : > { %s3840_s15 = scalar_select %p3251_p5, 1, 0 }
  0x14   : > { %s3841_s16 = scalar_select %p3255_p6, 1, 0 }
  0x15   : > { %p232_p8 = scmp.lt.s32.totalorder %s3149_s30, 3  ;;  %p3829_p9 = scmp.eq.s32.totalorder %s3234_s9, 0 }
  0x16   : > { %3842 = sst [smem:[#allocation22_spill]] %s3841_s16  ;;  %s3151_s18 = smov [#allocation5]  }
  0x17   : > { %p3262_p10 = pnand %p2189_p7, %p232_p8  ;;  %s257_s19 = sshll.u32 %s3151_s18, 4  ;;  %s3268_s19 = int_to_ptr.vmem [resolvable:$true] %s257_s19 }
  0x18   : > { %s3152_s21 = smov [#allocation8]   ;;  %s3153_s23 = smov [#allocation2]  }
  0x19   : > { %s3843_s17 = scalar_select %p3262_p10, 1, 0 }
  0x1a   : > { %p2722_p11 = pneg %p3262_p10  ;;  %s283_s22 = sshll.u32 %s3152_s21, 4  ;;  %s3276_s22 = int_to_ptr.vmem [resolvable:$true] %s283_s22 }
  0x1b   : > { %s3278_s24 = sshll.u32 %s3153_s23, 4  ;;  %s3845_s1 = sld [smem:[#allocation23_spill]]  ;;  %s245_s24 = int_to_ptr.vmem [resolvable:$true] %s3278_s24 }
  0x1c   : > { %p3272_p12 = pnand %p3829_p9, %p2722_p11 }
  0x1e   : > { %p3288_p0 = pneg %p3272_p12 }
  0x21   : > { %s2903_s10 = scalar_lea.hbm %s3845_s1, 256 }
  0x22   : > { %p2904_p13 = scmp.ne.s32.totalorder %s3845_s1, %s2903_s10  ;;  %p2910_p3 = scmp.lt.u32.totalorder %s2903_s10, %s3845_s1 }
  0x24   : > { %p2906_p1 = pnand %p3288_p0, %p2904_p13 }
  0x26   : > { %p2907_p2 = pneg %p2906_p1 }
  0x28   : > { %p2912_p4 = pnand %p2910_p3, %p2907_p2 }
  0x2a   : > { %2915 = shalt.err (!%p2912_p4)
}
  0x2b   : > { %s2916_s25 = scalar_lea.vmem %s3268_s19, 256  ;;  %p2924_p9 = scmp.lt.s32.totalorder %s3268_s19, %s3268_s19 }
  0x2c   : > { %p2917_p7 = scmp.ne.s32.totalorder %s3268_s19, %s2916_s25  ;;  %p2925_p6 = scmp.lt.s32.totalorder %s2916_s25, %s2916_s25 }
  0x2e   : > { %p2919_p8 = pnand %p2917_p7, %p3288_p0  ;;  %p2926_p13 = por %p2925_p6, %p2924_p9 }
  0x30   : > { %p2920_p11 = pneg %p2919_p8 }
  0x32   : > { %p2927_p1 = pnand %p2926_p13, %p2920_p11 }
  0x34   : > { %2930 = shalt.err (!%p2927_p1)
}
  0x35   : > { %s3154_s26 = smov 128   ;;  %s3155_s10 = smov 8  }
  0x36   : > { %2728 = dma.hbm_to_vmem [thread:$0]  (!%p3272_p12), %s3845_s1, 256, %s3268_s19, [#allocation6], %s3154_s26, %s3154_s26, %s3155_s10  }
  0x37   : > { %s2931_s25 = scalar_lea.hbm %s3823_s3, 256 }
  0x38   : > { %p2932_p6 = scmp.ne.s32.totalorder %s3823_s3, %s2931_s25  ;;  %p2938_p3 = scmp.lt.u32.totalorder %s2931_s25, %s3823_s3 }
  0x3a   : > { %p2934_p9 = pnand %p2932_p6, %p3288_p0 }
  0x3c   : > { %p2935_p2 = pneg %p2934_p9 }
  0x3e   : > { %p2940_p4 = pnand %p2938_p3, %p2935_p2 }
  0x40   : > { %2943 = shalt.err (!%p2940_p4)
}
  0x41   : > { %s2944_s19 = scalar_lea.vmem %s3276_s22, 256  ;;  %p2952_p13 = scmp.lt.s32.totalorder %s3276_s22, %s3276_s22 }
  0x42   : > { %p2945_p7 = scmp.ne.s32.totalorder %s3276_s22, %s2944_s19  ;;  %p2953_p1 = scmp.lt.s32.totalorder %s2944_s19, %s2944_s19 }
  0x44   : > { %p2947_p8 = pnand %p2945_p7, %p3288_p0  ;;  %p2954_p6 = por %p2953_p1, %p2952_p13 }
  0x46   : > { %p2948_p11 = pneg %p2947_p8 }
  0x48   : > { %p2955_p9 = pnand %p2954_p6, %p2948_p11 }
  0x4a   : > { %2958 = shalt.err (!%p2955_p9)
}
  0x4b   : > { %2734 = dma.hbm_to_vmem [thread:$0]  (!%p3272_p12), %s3823_s3, 256, %s3276_s22, [#allocation9], %s3154_s26, %s3154_s26, %s3155_s10  }
  0x4c   : > { %s2959_s12 = scalar_lea.hbm %s3820_s0, 256 }
  0x4d   : > { %p2960_p2 = scmp.ne.s32.totalorder %s3820_s0, %s2959_s12  ;;  %p2966_p7 = scmp.lt.u32.totalorder %s2959_s12, %s3820_s0 }
  0x4f   : > { %p2962_p3 = pnand %p2960_p2, %p3288_p0 }
  0x51   : > { %p2963_p4 = pneg %p2962_p3 }
  0x53   : > { %p2968_p8 = pnand %p2966_p7, %p2963_p4 }
  0x55   : > { %2971 = shalt.err (!%p2968_p8)
}
  0x56   : > { %s2972_s19 = scalar_lea.vmem %s245_s24, 256  ;;  %p2980_p6 = scmp.lt.s32.totalorder %s245_s24, %s245_s24 }
  0x57   : > { %p2973_p11 = scmp.ne.s32.totalorder %s245_s24, %s2972_s19  ;;  %p2981_p9 = scmp.lt.s32.totalorder %s2972_s19, %s2972_s19 }
  0x59   : > { %p2975_p13 = pnand %p2973_p11, %p3288_p0  ;;  %p2982_p5 = por %p2981_p9, %p2980_p6 }
  0x5b   : > { %p2976_p1 = pneg %p2975_p13 }
  0x5d   : > { %p2983_p10 = pnand %p2982_p5, %p2976_p1 }
  0x5f   : > { %2986 = shalt.err (!%p2983_p10)
}
  0x60   : > { %2725 = dma.hbm_to_vmem [thread:$0]  (!%p3272_p12), %s3820_s0, 256, %s245_s24, [#allocation3], %s3154_s26, %s3154_s26, %s3155_s10  }
  0x61   : > { %s3156_s11 = smov [#allocation7]   ;;  %s3157_s16 = smov [#allocation10]  }
  0x62   : > { %s270_s14 = sshll.u32 %s3156_s11, 4  ;;  %s302_s12 = sshll.u32 %s3157_s16, 4  ;;  %s271_s14 = int_to_ptr.vmem [resolvable:$true] %s270_s14  ;;  %s303_s12 = int_to_ptr.vmem [resolvable:$true] %s302_s12 }
  0x63   : > { %s2987_s23 = scalar_lea.hbm %s3822_s2, 256 }
  0x64   : > { %p2988_p5 = scmp.ne.s32.totalorder %s3822_s2, %s2987_s23  ;;  %p2994_p3 = scmp.lt.u32.totalorder %s2987_s23, %s3822_s2 }
  0x66   : > { %p2990_p10 = pnand %p2988_p5, %p3288_p0 }
  0x68   : > { %p2991_p2 = pneg %p2990_p10 }
  0x6a   : > { %p2996_p4 = pnand %p2994_p3, %p2991_p2 }
  0x6c   : > { %2999 = shalt.err (!%p2996_p4)
}
  0x6d   : > { %s3000_s24 = scalar_lea.vmem %s271_s14, 256  ;;  %p3008_p13 = scmp.lt.s32.totalorder %s271_s14, %s271_s14 }
  0x6e   : > { %p3001_p7 = scmp.ne.s32.totalorder %s271_s14, %s3000_s24  ;;  %p3009_p1 = scmp.lt.s32.totalorder %s3000_s24, %s3000_s24 }
  0x70   : > { %p3003_p8 = pnand %p3001_p7, %p3288_p0  ;;  %p3010_p6 = por %p3009_p1, %p3008_p13 }
  0x72   : > { %p3004_p11 = pneg %p3003_p8 }
  0x74   : > { %p3011_p9 = pnand %p3010_p6, %p3004_p11 }
  0x76   : > { %3014 = shalt.err (!%p3011_p9)
}
  0x77   : > { %2731 = dma.hbm_to_vmem [thread:$0]  (!%p3272_p12), %s3822_s2, 256, %s271_s14, [#allocation6], %s3154_s26, %s3154_s26, %s3155_s10  }
  0x78   : > { %s3015_s13 = scalar_lea.hbm %s3826_s6, 256 }
  0x79   : > { %p3016_p5 = scmp.ne.s32.totalorder %s3826_s6, %s3015_s13  ;;  %p3022_p3 = scmp.lt.u32.totalorder %s3015_s13, %s3826_s6 }
  0x7b   : > { %p3018_p10 = pnand %p3016_p5, %p3288_p0 }
  0x7d   : > { %p3019_p2 = pneg %p3018_p10 }
  0x7f   : > { %p3024_p4 = pnand %p3022_p3, %p3019_p2 }
  0x81   : > { %3027 = shalt.err (!%p3024_p4)
}
  0x82   : > { %s3028_s22 = scalar_lea.vmem %s303_s12, 256  ;;  %p3036_p13 = scmp.lt.s32.totalorder %s303_s12, %s303_s12 }
  0x83   : > { %p3029_p7 = scmp.ne.s32.totalorder %s303_s12, %s3028_s22  ;;  %p3037_p1 = scmp.lt.s32.totalorder %s3028_s22, %s3028_s22 }
  0x85   : > { %p3031_p8 = pnand %p3029_p7, %p3288_p0  ;;  %p3038_p6 = por %p3037_p1, %p3036_p13 }
  0x87   : > { %p3032_p11 = pneg %p3031_p8 }
  0x89   : > { %p3039_p9 = pnand %p3038_p6, %p3032_p11 }
  0x8b   : > { %3042 = shalt.err (!%p3039_p9)
}
  0x8c   : > { %2737 = dma.hbm_to_vmem [thread:$0]  (!%p3272_p12), %s3826_s6, 256, %s303_s12, [#allocation9], %s3154_s26, %s3154_s26, %s3155_s10  }
  0x8d   : > { %p3847_p5 = scmp.ne.s32.totalorder %s3843_s17, 0 }
  0x8e   : > { %p3848_p0 = scmp.eq.s32.totalorder (!%p3847_p5), %s3234_s9, 0 }
  0x8f   : > { %318 = sbr.rel (%p3847_p5) target bundleno = 2724 (0xaa4), region = 48 }
  0x96   : > { %3116 = dma.done.wait (%p3848_p0), [#allocation3], 256   ;;  %p3849_p10 = pmov %p3848_p0 }
  0x97   : > { %p3850_p2 = pmov %p3848_p0 }
  0x98   : > { %3118 = vsyncadd (%p3849_p10), [#allocation3], 4294967040 }
  0x99   : > { %3120 = dma.done.wait (%p3850_p2), [#allocation6], 512   ;;  %p3851_p3 = pmov %p3848_p0 }
  0x9a   : > { %p3852_p4 = pmov %p3848_p0 }
  0x9b   : > { %3122 = vsyncadd (%p3851_p3), [#allocation6], 4294966784 }
  0x9c   : > { %3124 = dma.done.wait (%p3852_p4), [#allocation9], 512   ;;  %p3853_p12 = pmov %p3848_p0 }
  0x9d   : > { %s3417_s17 = sshll.u32 %s3234_s9, 3  ;;  %v369_v0 = vld [vmem:[%s3824_s4] sm:$0xff]  ;;  %v374_v1 = vld [vmem:[%s3824_s4 + $0x28] sm:$0xff]  ;;  %v379_v2 = vld [vmem:[%s3824_s4 + $0x50] sm:$0xff]  ;;  %vm433_vm0 = vcmask 261120   ;;  %v429_v36 = vlaneseq  ;;  %vm802_vm1 = vcmask 64512  }
  0x9e   : > { %3126 = vsyncadd (%p3853_p12), [#allocation9], 4294966784  ;;  %v2546_v3 = vpack.c.bf16 %v374_v1, %v369_v0  ;;  %v384_v4 = vld [vmem:[%s3824_s4 + $0x78] sm:$0xff]  ;;  %s419_s16 = scalar_lea.vmem [#allocation2], %s3417_s17  ;;  %s423_s13 = scalar_lea.vmem [#allocation7], %s3417_s17  ;;  %v370_v9 = vld [vmem:[%s3824_s4 + $0x8] sm:$0xff] }
  0x9f   : > { %v3432_v5 = vld [vmem:[%s419_s16] sm:$0xff]  ;;  %v2550_v7 = vpack.c.bf16 %v384_v4, %v379_v2  ;;  %v375_v10 = vld [vmem:[%s3824_s4 + $0x30] sm:$0xff]  ;;  %s421_s22 = scalar_lea.vmem [#allocation5], %s3417_s17  ;;  %s425_s14 = scalar_lea.vmem [#allocation8], %s3417_s17  ;;  %v380_v16 = vld [vmem:[%s3824_s4 + $0x58] sm:$0xff]  ;;  %v3476_v37 = vshrl.u32 %v429_v36, 7 }
  0xa0   : > { %v424_v6 = vld [vmem:[%s423_s13] sm:$0xff]  ;;  %2547 = vmatprep.subr.bf16.mxu0 %v2546_v3  ;;  %v2554_v13 = vpack.c.bf16 %v375_v10, %v370_v9  ;;  %v408_v21 = vld [vmem:[#allocation2 + $0x8] sm:$0xff]  ;;  %v409_v23 = vld [vmem:[#allocation5] sm:$0xff]  ;;  %s3158_s23 = smov 112   ;;  %s3159_s25 = smov 120   ;;  %vm3161_vm13 = vmmov 1  }
  0xa1   : > { %v427_v8 = vadd.f32 %v424_v6, %v3432_v5  ;;  %2549 = vmatpush3.bf16.msra.mxu0 %v2546_v3  ;;  %v3444_v11 = vld [vmem:[%s421_s22] sm:$0xff]  ;;  %v412_v22 = vld [vmem:[#allocation7 + $0x8] sm:$0xff]  ;;  %v415_v24 = vld [vmem:[#allocation8] sm:$0xff]  ;;  %v431_v38 = vsub.s32 0, %v3476_v37  ;;  %v517_v42 = vsub.s32 1, %v3476_v37  ;;  %s3160_s19 = smov 104  }
  0xa2   : > { %v426_v12 = vld [vmem:[%s425_s14] sm:$0xff]  ;;  %2551 = vmatprep.subr.bf16.mxu0 %v2550_v7  ;;  %v414_v25 = vadd.f32 %v412_v22, %v408_v21  ;;  %v417_v26 = vadd.f32 %v415_v24, %v409_v23  ;;  %v410_v27 = vld [vmem:[#allocation5 + $0x8] sm:$0xff]  ;;  %v371_v30 = vld [vmem:[%s3824_s4 + $0x10] sm:$0xff]  ;;  %v618_v62 = vsub.s32 2, %v3476_v37  ;;  %s3163_s12 = smov 8   ;;  %s3164_s1 = smov 16  }
  0xa3   : > { %2370 = vmatprep.mubr.msk.f32.mxu0 %vm433_vm0, %v427_v8  ;;  %v407_v14 = vld [vmem:[#allocation2] sm:$0xff]  ;;  %v428_v18 = vadd.f32 %v426_v12, %v3444_v11  ;;  %v416_v28 = vld [vmem:[#allocation8 + $0x8] sm:$0xff]  ;;  %v386_v34 = vld [vmem:[%s3824_s4 + $0x88] sm:$0xff]  ;;  %s3165_s29 = smov 24   ;;  %p3856_p8 = scmp.ne.s32.totalorder %s3840_s15, 0 }
  0xa4   : > { %v411_v15 = vld [vmem:[#allocation7] sm:$0xff]  ;;  %v418_v29 = vadd.f32 %v416_v28, %v410_v27  ;;  %v376_v31 = vld [vmem:[%s3824_s4 + $0x38] sm:$0xff]  ;;  %vm3491_vm2 = vmpackc.low %vm802_vm1, %vm802_vm1  ;;  %s3166_s11 = smov [#allocation12]  }
  0xa5   : > { %v385_v17 = vld [vmem:[%s3824_s4 + $0x80] sm:$0xff]  ;;  %2553 = vmatpush3.bf16.msra.mxu0 %v2550_v7  ;;  %v413_v19 = vadd.f32 %v411_v15, %v407_v14  ;;  %v2562_v33 = vpack.c.bf16 %v376_v31, %v371_v30  ;;  %s3047_s16 = sshll.u32 %s3166_s11, 4  ;;  %s3048_s16 = int_to_ptr.vmem [resolvable:$false] %s3047_s16 }
  0xa6   : > { %2555 = vmatprep.subr.bf16.mxu0 %v2554_v13  ;;  %v2558_v20 = vpack.c.bf16 %v385_v17, %v380_v16  ;;  %v381_v32 = vld [vmem:[%s3824_s4 + $0x60] sm:$0xff]  ;;  %s3049_s13 = scalar_lea.vmem %s3048_s16, 256 }
  0xa7   : > { %v2566_v35 = vpack.c.bf16 %v386_v34, %v381_v32  ;;  %v3479_v39 = vld [vmem:[#allocation10] sm:$0xff] }
  0xa8   : > { %2371 = vmatmul.mubr.msk.f32.vlgmr.msra.gmra.mrb[0].mxu0 %vm433_vm0, %v428_v18  ;;  %v432_v40 = vrot.slane %v3479_v39, %v431_v38  ;;  %v518_v45 = vrot.slane %v3479_v39, %v517_v42  ;;  %v619_v10 = vrot.slane %v3479_v39, %v618_v62 }
  0xa9   : > { %2557 = vmatpush3.bf16.msra.mxu0 %v2554_v13  ;;  %2381 = vmatprep.mubr.msk.f32.mxu0 %vm433_vm0, %v413_v19 }
  0xaa   : > { %2559 = vmatprep.subr.bf16.mxu0 %v2558_v20 }
  0xad   : > { %2561 = vmatpush3.bf16.msra.mxu0 %v2558_v20 }
  0xae   : > { %2563 = vmatprep.subr.bf16.mxu0 %v2562_v33 }
  0xb0   : > { %2382 = vmatmul.mubr.msk.f32.vlgmr.msra.gmra.mrb[2].mxu0 %vm433_vm0, %v414_v25 }
  0xb1   : > { %2384 = vmatprep.mubr.msk.f32.mxu0 %vm433_vm0, %v417_v26  ;;  %2565 = vmatpush3.bf16.msra.mxu0 %v2562_v33 }
  0xb2   : > { %2567 = vmatprep.subr.bf16.mxu0 %v2566_v35 }
  0xb4   : > { %2385 = vmatmul.mubr.msk.f32.gmra.mrb[4].mxu0 %vm433_vm0, %v418_v29 }
  0xb5   : > { %2395 = vmatprep.mubr.msk.f32.mxu0 %vm433_vm0, %v407_v14  ;;  %2569 = vmatpush3.bf16.msra.mxu0 %v2566_v35 }
  0xb8   : > { %2396 = vmatmul.mubr.msk.f32.vlgmr.msra.gmra.mrb[6].mxu0 %vm433_vm0, %v408_v21 }
  0xb9   : > { %2398 = vmatprep.mubr.msk.f32.mxu0 %vm433_vm0, %v409_v23 }
  0xbc   : > { %2399 = vmatmul.mubr.msk.f32.gmra.mrb[8].mxu0 %vm433_vm0, %v410_v27 }
 0x17b   : > { %v2372_v41 = vpop.f32.mrb[0].mxu0 }
 0x17c   : > { %v506_v43 = vpop.f32.mrb[1].mxu0  ;;  %v512_v59 = vadd.f32 %v2372_v41, %v432_v40 }
 0x17d   : > { %v507_v44 = vadd.f32 %v506_v43, %v432_v40 }
 0x17f   : > { %2409 = vmatprep.mubr.msk.f32.mxu1 %vm802_vm1, %v507_v44 }
 0x183   : > { %v2383_v46 = vpop.f32.mrb[2].mxu0 }
 0x184   : > { %v603_v47 = vadd.f32 %v2383_v46, %v518_v45  ;;  %v597_v48 = vpop.f32.mrb[3].mxu0 }
 0x185   : > { %v598_v49 = vadd.f32 %v597_v48, %v518_v45 }
 0x187   : > { %v2386_v51 = vpop.f32.mrb[4].mxu0  ;;  %v2813_v52 = vpack.i.bf16 %v603_v47, %v598_v49  ;;  %v2570_v53 = vpack.c.bf16 %v603_v47, %v598_v49 }
 0x188   : > { %v613_v54 = vadd.f32 %v2386_v51, %v518_v45  ;;  %v607_v55 = vpop.f32.mrb[5].mxu0 }
 0x189   : > { %v608_v56 = vadd.f32 %v607_v55, %v518_v45  ;;  %2814 = vrot.lane.b32.xlu1 %v2813_v52, %s3158_s23  ;;  %2804 = vrot.lane.b32.xlu0 %v2813_v52, %s3159_s25  ;;  %v724_v45 = vstv %s3417_s17 }
 0x18a   : > { %2572 = vmatprep.subr.msk.bf16.mxu1 %vm3491_vm2, %v2570_v53  ;;  %v725_v47 = vadd.s32 %v724_v45, %v3476_v37 }
 0x18b   : > { %2575 = vmatpush3.bf16.xpose.msk.msra.mxu1 %vm3491_vm2, %v2570_v53  ;;  %v2808_v57 = vpack.i.bf16 %v613_v54, %v608_v56  ;;  %v2576_v58 = vpack.c.bf16 %v613_v54, %v608_v56  ;;  %v2397_v3 = vpop.f32.mrb[6].mxu0 }
 0x18c   : > { %v698_v4 = vpop.f32.mrb[7].mxu0  ;;  %v3533_v23 = vadd.f32 %v2397_v3, %v619_v10  ;;  %v728_v49 = vsub.s32 0, %v725_v47  ;;  %vm727_vm4 = vcmp.lt.s32.totalorder %v725_v47, 0 }
 0x18d   : > { %2819 = vrot.lane.b32.xlu1 %v2813_v52, %s3160_s19  ;;  %2809 = vrot.lane.b32.xlu0 %v2808_v57, %s3159_s25  ;;  %v3535_v24 = vadd.f32 %v698_v4, %v619_v10 }
 0x18e   : > { %2578 = vmatprep.subr.msk.bf16.mxu1 %vm3491_vm2, %v2576_v58  ;;  %v2214_v52 = vmin.u32 %v728_v49, %v725_v47 }
 0x18f   : > { %v2400_v14 = vpop.f32.mrb[8].mxu0  ;;  %v2618_v31 = vpack.c.bf16 %v3533_v23, %v3535_v24 }
 0x190   : > { %v3526_v15 = vadd.f32 %v2400_v14, %v619_v10  ;;  %v708_v16 = vpop.f32.mrb[9].mxu0  ;;  %v731_v54 = vand.u32 1, %v2214_v52 }
 0x191   : > { %898 = vrot.lane.b32.xlu1 %v512_v59, %s3159_s25  ;;  %896 = vrot.lane.b32.xlu0 %v507_v44, %s3159_s25  ;;  %v3528_v18 = vadd.f32 %v708_v16, %v619_v10 }
 0x192   : > { %v732_v56 = vsub.s32 0, %v731_v54 }
 0x193   : > { %2581 = vmatpush3.bf16.xpose.msk.msra.mxu1 %vm3491_vm2, %v2576_v58 }
 0x195   : > { %2829 = vrot.lane.b32.xlu1 %v2808_v57, %s3160_s19  ;;  %2824 = vrot.lane.b32.xlu0 %v2808_v57, %s3158_s23  ;;  %v733_v57 = vsel %vm727_vm4, %v732_v56, %v731_v54  ;;  %vm1682_vm4 = vcmask 195584  }
 0x196   : > { %vm741_vm7 = vcmp.ne.s32.totalorder %v733_v57, 0  ;;  %vm743_vm8 = vcmp.lt.s32.totalorder %v733_v57, 0 }
 0x197   : > { %vm745_vm10 = vmand %vm743_vm8, %vm741_vm7 }
 0x199   : > { %997 = vrot.lane.b32.xlu1 %v512_v59, %s3158_s23  ;;  %995 = vrot.lane.b32.xlu0 %v507_v44, %s3158_s23 }
 0x19a   : > { %2410 = vmatmul.mubr.msk.f32.vlgmr.msra.gmra.mrb[0].mxu1 %vm802_vm1, %v512_v59 }
 0x19d   : > { %1096 = vrot.lane.b32.xlu1 %v512_v59, %s3160_s19  ;;  %1094 = vrot.lane.b32.xlu0 %v507_v44, %s3160_s19  ;;  %v721_v44 = vand.u32 127, %v429_v36  ;;  %v747_v36 = vadd.s32 2, %v733_v57 }
 0x19f   : > { %v2218_v46 = vadd.s32 4294967280, %v721_v44  ;;  %v772_v59 = vand.u32 1, %v721_v44  ;;  %vm767_vm11 = vcmp.lt.s32.totalorder %v721_v44, 16 }
 0x1a0   : > { %vm796_vm14 = vmxor %vm3161_vm13, %vm767_vm11 }
 0x1a1   : > { %v782_v48 = vsub.s32 0, %v2218_v46  ;;  %vm781_vm3 = vcmp.lt.s32.totalorder %v2218_v46, 0 }
 0x1a3   : > { %v2219_v51 = vmin.u32 %v2218_v46, %v782_v48 }
 0x1a5   : > { %v785_v53 = vand.u32 1, %v2219_v51 }
 0x1a7   : > { %v786_v55 = vsub.s32 0, %v785_v53 }
 0x1a9   : > { %v787_v50 = vsel %vm781_vm3, %v786_v55, %v785_v53  ;;  %vm1679_vm3 = vcmask 130048  }
 0x1aa   : > { %vm788_vm5 = vcmp.ne.s32.totalorder %v787_v50, 0  ;;  %vm789_vm6 = vcmp.lt.s32.totalorder %v787_v50, 0  ;;  %v791_v58 = vadd.s32 2, %v787_v50 }
 0x1ab   : > { %vm790_vm9 = vmand %vm789_vm6, %vm788_vm5 }
 0x1fb   : > { %v2815_v60 = vpop.permute.xlu1 %2814  ;;  %v2805_v61 = vpop.permute.xlu0 %2804 }
 0x1fc   : > { %v2817_v63 = vunpack.i.h.bf16 %v2815_v60  ;;  %v2816_v0 = vunpack.i.l.bf16 %v2815_v60  ;;  %v2807_v1 = vunpack.i.h.bf16 %v2805_v61  ;;  %v2806_v2 = vunpack.i.l.bf16 %v2805_v61 }
 0x1fd   : > { %v792_v60 = vsel %vm790_vm9, %v791_v58, %v787_v50  ;;  %v749_v61 = vsel %vm745_vm10, %v747_v36, %v733_v57 }
 0x1fe   : > { %v2594_v6 = vpack.c.bf16 %v2817_v63, %v2816_v0  ;;  %v2582_v7 = vpack.c.bf16 %v2807_v1, %v2806_v2  ;;  %v793_v62 = vsel %vm767_vm11, %v772_v59, %v792_v60  ;;  %v2622_v63 = vpack.c.bf16 %v3526_v15, %v3528_v18 }
 0x1ff   : > { %v2820_v8 = vpop.permute.xlu1 %2819  ;;  %v2810_v9 = vpop.permute.xlu0 %2809  ;;  %v3565_v0 = vpack.i.bf16 %v3526_v15, %v3528_v18  ;;  %vm794_vm12 = vcmp.eq.s32.totalorder %v749_v61, %v793_v62  ;;  %v3162_v1 = vmov -1e+30  }
 0x200   : > { %v2812_v12 = vunpack.i.h.bf16 %v2810_v9  ;;  %v2811_v13 = vunpack.i.l.bf16 %v2810_v9  ;;  %2584 = vmatprep.subr.msk.bf16.mxu0 %vm3491_vm2, %v2582_v7  ;;  %2596 = vmatprep.subr.msk.bf16.mxu1 %vm3491_vm2, %v2594_v6  ;;  %v2822_v21 = vunpack.i.h.bf16 %v2820_v8  ;;  %v2821_v22 = vunpack.i.l.bf16 %v2820_v8  ;;  %vm799_vm15 = vmand %vm794_vm12, %vm767_vm11 }
 0x201   : > { %2587 = vmatpush3.bf16.xpose.msk.msra.mxu0 %vm3491_vm2, %v2582_v7  ;;  %2599 = vmatpush3.bf16.xpose.msk.msra.mxu1 %vm3491_vm2, %v2594_v6  ;;  %v801_v2 = vsel %vm799_vm15, 0.0, %v3162_v1 }
 0x202   : > { %v2588_v17 = vpack.c.bf16 %v2812_v12, %v2811_v13  ;;  %v2606_v26 = vpack.c.bf16 %v2822_v21, %v2821_v22 }
 0x203   : > { %v899_v19 = vpop.permute.xlu1 %898  ;;  %v897_v20 = vpop.permute.xlu0 %896 }
 0x204   : > { %2420 = vmatprep.mubr.msk.f32.mxu0 %vm802_vm1, %v897_v20  ;;  %2590 = vmatprep.subr.msk.bf16.mxu0 %vm3491_vm2, %v2588_v17 }
 0x207   : > { %v2825_v25 = vpop.permute.xlu0 %2824  ;;  %v2830_v29 = vpop.permute.xlu1 %2829 }
 0x208   : > { %v2827_v27 = vunpack.i.h.bf16 %v2825_v25  ;;  %v2826_v28 = vunpack.i.l.bf16 %v2825_v25  ;;  %v2832_v33 = vunpack.i.h.bf16 %v2830_v29  ;;  %v2831_v34 = vunpack.i.l.bf16 %v2830_v29 }
 0x209   : > { %2593 = vmatpush3.bf16.xpose.msk.msra.mxu0 %vm3491_vm2, %v2588_v17 }
 0x20a   : > { %v2600_v30 = vpack.c.bf16 %v2827_v27, %v2826_v28  ;;  %2608 = vmatprep.subr.msk.bf16.mxu0 %vm3491_vm2, %v2606_v26  ;;  %v2612_v40 = vpack.c.bf16 %v2832_v33, %v2831_v34 }
 0x20b   : > { %v996_v32 = vpop.permute.xlu0 %995  ;;  %v998_v41 = vpop.permute.xlu1 %997 }
 0x20c   : > { %2602 = vmatprep.subr.msk.bf16.mxu1 %vm3491_vm2, %v2600_v30  ;;  %2431 = vmatprep.mubr.msk.f32.mxu1 %vm802_vm1, %v996_v32  ;;  %v2833_v32 = vpack.i.bf16 %v3533_v23, %v3535_v24 }
 0x20d   : > { %2605 = vmatpush3.bf16.xpose.msk.msra.mxu1 %vm3491_vm2, %v2600_v30 }
 0x20e   : > { %2619 = vmatprep.subr.bf16.mxu1 %v2618_v31 }
 0x20f   : > { %v1095_v35 = vpop.permute.xlu0 %1094  ;;  %v1097_v43 = vpop.permute.xlu1 %1096 }
 0x210   : > { %2421 = vmatmul.mubr.msk.f32.vlgmr.msra.gmra.mrb[10].mxu0 %vm802_vm1, %v899_v19 }
 0x211   : > { %2611 = vmatpush3.bf16.xpose.msk.msra.mxu0 %vm3491_vm2, %v2606_v26  ;;  %2442 = vmatprep.mubr.msk.f32.mxu0 %vm802_vm1, %v1095_v35 }
 0x212   : > { %2614 = vmatprep.subr.msk.bf16.mxu0 %vm3491_vm2, %v2612_v40 }
 0x214   : > { %2432 = vmatmul.mubr.msk.f32.vlgmr.msra.gmra.mrb[2].mxu1 %vm802_vm1, %v998_v41 }
 0x215   : > { %2621 = vmatpush3.bf16.msra.mxu1 %v2618_v31 }
 0x216   : > { %2623 = vmatprep.subr.bf16.mxu1 %v2622_v63 }
 0x219   : > { %2617 = vmatpush3.bf16.xpose.msk.msra.mxu0 %vm3491_vm2, %v2612_v40  ;;  %2625 = vmatpush3.bf16.msra.mxu1 %v2622_v63  ;;  %vm798_vm2 = vmand %vm794_vm12, %vm796_vm14 }
 0x21a   : > { %v800_v3 = vsel %vm798_vm2, 0.0, %v3162_v1 }
 0x220   : > { %2443 = vmatmul.mubr.msk.f32.vlgmr.msra.gmra.mrb[12].mxu0 %vm802_vm1, %v1097_v43 }
 0x26d   : > { %v2411_v4 = vpop.f32.mrb[0].mxu1 }
 0x26e   : > { %v1194_v6 = vadd.f32 %v2411_v4, %v801_v2  ;;  %v887_v7 = vpop.f32.mrb[1].mxu1 }
 0x26f   : > { %v1193_v8 = vadd.f32 %v887_v7, %v800_v3 }
 0x270   : > { %v1204_v9 = vsel %vm433_vm0, %v1194_v6, -inf }
 0x271   : > { %1205 = vmax.xlane.f32.xlu1 %v1204_v9  ;;  %v1201_v10 = vsel %vm433_vm0, %v1193_v8, -inf }
 0x272   : > { %1202 = vmax.xlane.f32.xlu0 %v1201_v10 }
 0x2e3   : > { %v2422_v12 = vpop.f32.mrb[10].mxu0 }
 0x2e4   : > { %v1196_v13 = vadd.f32 %v2422_v12, %v801_v2  ;;  %v986_v14 = vpop.f32.mrb[11].mxu0 }
 0x2e5   : > { %v1195_v15 = vadd.f32 %v986_v14, %v800_v3 }
 0x2e6   : > { %v1210_v16 = vsel %vm433_vm0, %v1196_v13, -inf }
 0x2e7   : > { %1211 = vmax.xlane.f32.xlu0 %v1210_v16  ;;  %v2433_v17 = vpop.f32.mrb[2].mxu1  ;;  %v1207_v21 = vsel %vm433_vm0, %v1195_v15, -inf }
 0x2e8   : > { %v1085_v18 = vpop.f32.mrb[3].mxu1  ;;  %v1198_v20 = vadd.f32 %v2433_v17, %v801_v2 }
 0x2e9   : > { %v1197_v19 = vadd.f32 %v1085_v18, %v800_v3 }
 0x2ea   : > { %v1216_v25 = vsel %vm433_vm0, %v1198_v20, -inf }
 0x2eb   : > { %1208 = vmax.xlane.f32.xlu0 %v1207_v21  ;;  %v1213_v22 = vsel %vm433_vm0, %v1197_v19, -inf }
 0x2ec   : > { %1214 = vmax.xlane.f32.xlu1 %v1213_v22 }
 0x2ef   : > { %1217 = vmax.xlane.f32.xlu0 %v1216_v25 }
 0x2f3   : > { %v2444_v26 = vpop.f32.mrb[12].mxu0 }
 0x2f4   : > { %v1200_v27 = vadd.f32 %v2444_v26, %v801_v2  ;;  %v1184_v28 = vpop.f32.mrb[13].mxu0 }
 0x2f5   : > { %v1199_v29 = vadd.f32 %v1184_v28, %v800_v3 }
 0x2f6   : > { %v1222_v30 = vsel %vm433_vm0, %v1200_v27, -inf }
 0x2f7   : > { %1223 = vmax.xlane.f32.xlu0 %v1222_v30  ;;  %v1219_v31 = vsel %vm433_vm0, %v1199_v29, -inf }
 0x2f8   : > { %1220 = vmax.xlane.f32.xlu1 %v1219_v31 }
 0x2fe   : > { %v1206_v33 = vpop.xlane.xlu1 %1205 }
 0x2ff   : > { %v1226_v34 = vsub.f32 %v1194_v6, %v1206_v33  ;;  %v1203_v40 = vpop.xlane.xlu0 %1202 }
 0x300   : > { %v1225_v41 = vsub.f32 %v1193_v8, %v1203_v40 }
 0x301   : > { %v1235_v35 = vmul.f32 1.442695, %v1226_v34 }
 0x302   : > { %v1233_v43 = vmul.f32 1.442695, %v1225_v41 }
 0x303   : > { %2863 = vpow2.f32 %v1235_v35 }
 0x304   : > { %2865 = vpow2.f32 %v1233_v43 }
 0x309   : > { %2834 = vrot.lane.b32.xlu1 %v2833_v32, %s3159_s25 }
 0x30d   : > { %2839 = vrot.lane.b32.xlu0 %v3565_v0, %s3159_s25  ;;  %2844 = vrot.lane.b32.xlu1 %v2833_v32, %s3158_s23  ;;  %v3582_v44 = vpop.eup %2863 }
 0x30e   : > { %v1252_v23 = vsel %vm433_vm0, %v3582_v44, 0.0  ;;  %v3586_v24 = vpop.eup %2865 }
 0x30f   : > { %v1249_v45 = vsel %vm433_vm0, %v3586_v24, 0.0 }
 0x311   : > { %2849 = vrot.lane.b32.xlu1 %v2833_v32, %s3160_s19 }
 0x32c   : > { %1253 = vadd.xlane.f32.xlu0 %v1252_v23 }
 0x335   : > { %1250 = vadd.xlane.f32.xlu1 %v1249_v45 }
 0x374   : > { %v1212_v46 = vpop.xlane.xlu0 %1211 }
 0x375   : > { %v1228_v47 = vsub.f32 %v1196_v13, %v1212_v46 }
 0x377   : > { %v1239_v48 = vmul.f32 1.442695, %v1228_v47 }
 0x378   : > { %v1209_v49 = vpop.xlane.xlu0 %1208 }
 0x379   : > { %2867 = vpow2.f32 %v1239_v48  ;;  %v1227_v51 = vsub.f32 %v1195_v15, %v1209_v49  ;;  %v1215_v52 = vpop.xlane.xlu1 %1214 }
 0x37a   : > { %v1229_v53 = vsub.f32 %v1197_v19, %v1215_v52 }
 0x37b   : > { %v1237_v54 = vmul.f32 1.442695, %v1227_v51 }
 0x37c   : > { %v1241_v55 = vmul.f32 1.442695, %v1229_v53  ;;  %v1218_v56 = vpop.xlane.xlu0 %1217 }
 0x37d   : > { %2869 = vpow2.f32 %v1237_v54  ;;  %v1230_v50 = vsub.f32 %v1198_v20, %v1218_v56 }
 0x37e   : > { %2871 = vpow2.f32 %v1241_v55 }
 0x37f   : > { %v1243_v57 = vmul.f32 1.442695, %v1230_v50 }
 0x381   : > { %2873 = vpow2.f32 %v1243_v57 }
 0x383   : > { %v3590_v58 = vpop.eup %2867 }
 0x384   : > { %v1224_v36 = vpop.xlane.xlu0 %1223  ;;  %v1258_v59 = vsel %vm433_vm0, %v3590_v58, 0.0 }
 0x385   : > { %v1232_v60 = vsub.f32 %v1200_v27, %v1224_v36  ;;  %1259 = vadd.xlane.f32.xlu0 %v1258_v59  ;;  %v1221_v61 = vpop.xlane.xlu1 %1220 }
 0x386   : > { %v1231_v62 = vsub.f32 %v1199_v29, %v1221_v61 }
 0x387   : > { %v3594_v63 = vpop.eup %2869  ;;  %v1247_v1 = vmul.f32 1.442695, %v1232_v60 }
 0x388   : > { %v1245_v2 = vmul.f32 1.442695, %v1231_v62  ;;  %v2840_v3 = vpop.permute.xlu0 %2839  ;;  %v1255_v4 = vsel %vm433_vm0, %v3594_v63, 0.0  ;;  %v3598_v6 = vpop.eup %2871 }
 0x389   : > { %2875 = vpow2.f32 %v1247_v1  ;;  %v2842_v7 = vunpack.i.h.bf16 %v2840_v3  ;;  %1256 = vadd.xlane.f32.xlu1 %v1255_v4  ;;  %v2835_v8 = vpop.permute.xlu1 %2834  ;;  %v2841_v9 = vunpack.i.l.bf16 %v2840_v3  ;;  %v1261_v16 = vsel %vm433_vm0, %v3598_v6, 0.0  ;;  %v372_v4 = vld [vmem:[%s3824_s4 + $0x18] sm:$0xff] }
 0x38a   : > { %2877 = vpow2.f32 %v1245_v2  ;;  %v2837_v10 = vunpack.i.h.bf16 %v2835_v8  ;;  %v2836_v12 = vunpack.i.l.bf16 %v2835_v8  ;;  %v382_v8 = vld [vmem:[%s3824_s4 + $0x68] sm:$0xff] }
 0x38b   : > { %v3600_v13 = vpop.eup %2873  ;;  %v2630_v18 = vpack.c.bf16 %v2842_v7, %v2841_v9  ;;  %v387_v9 = vld [vmem:[%s3824_s4 + $0x90] sm:$0xff] }
 0x38c   : > { %v2626_v14 = vpack.c.bf16 %v2837_v10, %v2836_v12  ;;  %v1264_v15 = vsel %vm433_vm0, %v3600_v13, 0.0  ;;  %v2654_v12 = vpack.c.bf16 %v387_v9, %v382_v8  ;;  %v398_v8 = vld [vmem:[%s3825_s5 + $0x48] sm:$0xff] }
 0x38d   : > { %1265 = vadd.xlane.f32.xlu0 %v1264_v15  ;;  %1262 = vadd.xlane.f32.xlu1 %v1261_v16  ;;  %v2845_v17 = vpop.permute.xlu1 %2844 }
 0x38e   : > { %v2847_v19 = vunpack.i.h.bf16 %v2845_v17  ;;  %v2846_v20 = vunpack.i.l.bf16 %v2845_v17  ;;  %2627 = vmatprep.subr.bf16.mxu0 %v2626_v14 }
 0x38f   : > { %2629 = vmatpush3.bf16.msra.mxu0 %v2626_v14 }
 0x390   : > { %v2634_v21 = vpack.c.bf16 %v2847_v19, %v2846_v20  ;;  %2631 = vmatprep.subr.bf16.mxu0 %v2630_v18 }
 0x391   : > { %v2850_v22 = vpop.permute.xlu1 %2849 }
 0x392   : > { %v2852_v25 = vunpack.i.h.bf16 %v2850_v22  ;;  %v2851_v26 = vunpack.i.l.bf16 %v2850_v22  ;;  %2635 = vmatprep.subr.bf16.mxu1 %v2634_v21 }
 0x393   : > { %v2876_v27 = vpop.eup %2875  ;;  %2633 = vmatpush3.bf16.msra.mxu0 %v2630_v18 }
 0x394   : > { %v2878_v28 = vpop.eup %2877  ;;  %v2642_v29 = vpack.c.bf16 %v2852_v25, %v2851_v26  ;;  %v1270_v30 = vsel %vm433_vm0, %v2876_v27, 0.0 }
 0x395   : > { %1271 = vadd.xlane.f32.xlu0 %v1270_v30  ;;  %v1267_v31 = vsel %vm433_vm0, %v2878_v28, 0.0 }
 0x396   : > { %1268 = vadd.xlane.f32.xlu1 %v1267_v31  ;;  %2643 = vmatprep.subr.bf16.mxu0 %v2642_v29 }
 0x3a7   : > { %2859 = vrot.lane.b32.xlu1 %v3565_v0, %s3160_s19  ;;  %s2258_s19 = sshll.u32 %s3234_s9, 7 }
 0x3a8   : > { %s3746_s26 = scalar_lea.hbm %s3828_s8, %s2258_s19 }
 0x3ab   : > { %2854 = vrot.lane.b32.xlu0 %v3565_v0, %s3158_s23  ;;  %s3735_s23 = sand.u32 1, %s3141_s28  }
 0x3ac   : > { %s2201_s25 = sshll.u32 %s3735_s23, 3 }
 0x3ad   : > { %s367_s17 = scalar_lea.vmem [#allocation12], %s2201_s25  ;;  %s360_s14 = scalar_lea.vmem [#allocation11], %s2201_s25 }
 0x3ae   : > { %s2051_s22 = sshll.u32 %s367_s17, 4  ;;  %s2038_s24 = sshll.u32 %s360_s14, 4  ;;  %s3748_s22 = int_to_ptr.vmem [resolvable:$true] %s2051_s22  ;;  %s3755_s24 = int_to_ptr.vmem [resolvable:$true] %s2038_s24 }
 0x3af   : > { %p3050_p1 = scmp.lt.s32.totalorder %s3748_s22, %s3048_s16 }
 0x3b9   : > { %v1254_v32 = vpop.xlane.xlu0 %1253 }
 0x3ba   : > { %2879 = vrcp.f32 %v1254_v32  ;;  %v1687_v32 = vsub.s32 3, %v3476_v37 }
 0x3c2   : > { %v1251_v33 = vpop.xlane.xlu1 %1250 }
 0x3c3   : > { %2881 = vrcp.f32 %v1251_v33  ;;  %v1688_v33 = vrot.slane %v3479_v39, %v1687_v32 }
 0x3c4   : > { %v2880_v34 = vpop.eup %2879 }
 0x3c5   : > { %v1282_v41 = vmul.f32 %v2880_v34, %v3582_v44 }
 0x3cd   : > { %v2882_v35 = vpop.eup %2881 }
 0x3ce   : > { %v1281_v40 = vmul.f32 %v2882_v35, %v3586_v24 }
 0x3d0   : > { %2453 = vmatprep.mubr.msk.f32.mxu1 %vm433_vm0, %v1281_v40 }
 0x3d1   : > { %2454 = vmatmul.mubr.msk.f32.vlgmr.msra.gmra.mrb[4].mxu1 %vm433_vm0, %v1282_v41 }
 0x3d2   : > { %2637 = vmatpush3.bf16.msra.mxu1 %v2634_v21 }
 0x412   : > { %v1260_v43 = vpop.xlane.xlu0 %1259 }
 0x413   : > { %2883 = vrcp.f32 %v1260_v43 }
 0x416   : > { %v1257_v23 = vpop.xlane.xlu1 %1256 }
 0x417   : > { %2885 = vrcp.f32 %v1257_v23 }
 0x41a   : > { %v1263_v0 = vpop.xlane.xlu1 %1262  ;;  %v1266_v45 = vpop.xlane.xlu0 %1265 }
 0x41b   : > { %2887 = vrcp.f32 %v1263_v0 }
 0x41c   : > { %2889 = vrcp.f32 %v1266_v45 }
 0x41d   : > { %v2884_v46 = vpop.eup %2883 }
 0x41e   : > { %v1284_v44 = vmul.f32 %v2884_v46, %v3590_v58 }
 0x421   : > { %v2886_v47 = vpop.eup %2885 }
 0x422   : > { %v1272_v48 = vpop.xlane.xlu0 %1271  ;;  %v1283_v24 = vmul.f32 %v2886_v47, %v3594_v63 }
 0x423   : > { %2891 = vrcp.f32 %v1272_v48  ;;  %v1269_v49 = vpop.xlane.xlu1 %1268 }
 0x424   : > { %2893 = vrcp.f32 %v1269_v49  ;;  %2464 = vmatprep.mubr.msk.f32.mxu0 %vm433_vm0, %v1283_v24 }
 0x425   : > { %2465 = vmatmul.mubr.msk.f32.vlgmr.msra.gmra.mrb[14].mxu0 %vm433_vm0, %v1284_v44  ;;  %v2888_v51 = vpop.eup %2887 }
 0x426   : > { %2645 = vmatpush3.bf16.msra.mxu0 %v2642_v29  ;;  %v2855_v52 = vpop.permute.xlu0 %2854  ;;  %v1285_v56 = vmul.f32 %v2888_v51, %v3598_v6  ;;  %v2890_v58 = vpop.eup %2889  ;;  %v377_v6 = vld [vmem:[%s3824_s4 + $0x40] sm:$0xff] }
 0x427   : > { %v2857_v53 = vunpack.i.h.bf16 %v2855_v52  ;;  %v2856_v54 = vunpack.i.l.bf16 %v2855_v52  ;;  %v2860_v55 = vpop.permute.xlu1 %2859  ;;  %v1286_v61 = vmul.f32 %v2890_v58, %v3600_v13  ;;  %v2650_v7 = vpack.c.bf16 %v377_v6, %v372_v4  ;;  %v390_v58 = vld [vmem:[%s3825_s5 + $0x8] sm:$0xff]  ;;  %v396_v4 = vld [vmem:[%s3825_s5 + $0x38] sm:$0xff] }
 0x428   : > { %v2862_v50 = vunpack.i.h.bf16 %v2860_v55  ;;  %v2861_v57 = vunpack.i.l.bf16 %v2860_v55  ;;  %2475 = vmatprep.mubr.msk.f32.mxu1 %vm433_vm0, %v1285_v56  ;;  %v383_v56 = vld [vmem:[%s3824_s4 + $0x70] sm:$0xff] }
 0x429   : > { %v2638_v36 = vpack.c.bf16 %v2857_v53, %v2856_v54  ;;  %v373_v53 = vld [vmem:[%s3824_s4 + $0x20] sm:$0xff]  ;;  %v378_v54 = vld [vmem:[%s3824_s4 + $0x48] sm:$0xff] }
 0x42a   : > { %v2646_v59 = vpack.c.bf16 %v2862_v50, %v2861_v57  ;;  %v2658_v55 = vpack.c.bf16 %v378_v54, %v373_v53  ;;  %v388_v50 = vld [vmem:[%s3824_s4 + $0x98] sm:$0xff] }
 0x42b   : > { %2639 = vmatprep.subr.bf16.mxu1 %v2638_v36  ;;  %v2662_v57 = vpack.c.bf16 %v388_v50, %v383_v56 }
 0x42c   : > { %2641 = vmatpush3.bf16.msra.mxu1 %v2638_v36  ;;  %2647 = vmatprep.subr.bf16.mxu0 %v2646_v59  ;;  %v389_v36 = vld [vmem:[%s3825_s5] sm:$0xff] }
 0x42d   : > { %v2892_v60 = vpop.eup %2891  ;;  %2649 = vmatpush3.bf16.msra.mxu0 %v2646_v59  ;;  %2651 = vmatprep.subr.bf16.mxu1 %v2650_v7  ;;  %v391_v59 = vld [vmem:[%s3825_s5 + $0x10] sm:$0xff] }
 0x42e   : > { %v2894_v62 = vpop.eup %2893  ;;  %v1288_v1 = vmul.f32 %v2892_v60, %v2876_v27  ;;  %2659 = vmatprep.subr.bf16.mxu0 %v2658_v55  ;;  %v2666_v60 = vpack.c.bf16 %v390_v58, %v389_v36 }
 0x42f   : > { %2476 = vmatmul.mubr.msk.f32.vlgmr.msra.gmra.mrb[6].mxu1 %vm433_vm0, %v1286_v61  ;;  %v1287_v63 = vmul.f32 %v2894_v62, %v2878_v28  ;;  %v392_v61 = vld [vmem:[%s3825_s5 + $0x18] sm:$0xff] }
 0x430   : > { %2653 = vmatpush3.bf16.msra.mxu1 %v2650_v7  ;;  %v2670_v62 = vpack.c.bf16 %v392_v61, %v391_v59  ;;  %v397_v7 = vld [vmem:[%s3825_s5 + $0x40] sm:$0xff] }
 0x431   : > { %2486 = vmatprep.mubr.msk.f32.mxu0 %vm433_vm0, %v1287_v63  ;;  %2655 = vmatprep.subr.bf16.mxu1 %v2654_v12  ;;  %v393_v63 = vld [vmem:[%s3825_s5 + $0x20] sm:$0xff]  ;;  %v2682_v9 = vpack.c.bf16 %v398_v8, %v397_v7 }
 0x432   : > { %2487 = vmatmul.mubr.msk.f32.vlgmr.msra.gmra.mrb[16].mxu0 %vm433_vm0, %v1288_v1  ;;  %v394_v1 = vld [vmem:[%s3825_s5 + $0x28] sm:$0xff] }
 0x433   : > { %2661 = vmatpush3.bf16.msra.mxu0 %v2658_v55 }
 0x434   : > { %2657 = vmatpush3.bf16.msra.mxu1 %v2654_v12  ;;  %2663 = vmatprep.subr.bf16.mxu0 %v2662_v57  ;;  %v400_v12 = vld [vmem:[%s3825_s5 + $0x58] sm:$0xff] }
 0x435   : > { %2667 = vmatprep.subr.bf16.mxu1 %v2666_v60 }
 0x437   : > { %2665 = vmatpush3.bf16.msra.mxu0 %v2662_v57 }
 0x4a4   : > { %v2455_v2 = vpop.f32.mrb[4].mxu1 }
 0x4a5   : > { %v1361_v3 = vpop.f32.mrb[5].mxu1 }
 0x4f8   : > { %v2466_v10 = vpop.f32.mrb[14].mxu0 }
 0x4f9   : > { %1657 = vrot.lane.b32.xlu1 %v2466_v10, %s3163_s12  ;;  %v1458_v13 = vpop.f32.mrb[15].mxu0  ;;  %v399_v10 = vld [vmem:[%s3825_s5 + $0x50] sm:$0xff] }
 0x4fa   : > { %1655 = vrot.lane.b32.xlu0 %v1458_v13, %s3163_s12  ;;  %v2686_v13 = vpack.c.bf16 %v400_v12, %v399_v10  ;;  %v406_v10 = vld [vmem:[#allocation10 + $0x8] sm:$0x3]  ;;  %s3753_s12 = scalar_lea.hbm %s3827_s7, %s2258_s19 }
 0x4fb   : > { %v2008_v12 = vrot.slane %v406_v10, %v431_v38 }
 0x502   : > { %v2477_v14 = vpop.f32.mrb[6].mxu1 }
 0x503   : > { %v1551_v15 = vpop.f32.mrb[7].mxu1  ;;  %1665 = vrot.lane.b32.xlu1 %v2477_v14, %s3164_s1  ;;  %v401_v14 = vld [vmem:[%s3825_s5 + $0x60] sm:$0xff] }
 0x504   : > { %1663 = vrot.lane.b32.xlu0 %v1551_v15, %s3164_s1  ;;  %v402_v15 = vld [vmem:[%s3825_s5 + $0x68] sm:$0xff]  ;;  %s2025_s1 = scalar_lea.sflag [#allocation13], %s3735_s23 }
 0x505   : > { %v2488_v16 = vpop.f32.mrb[16].mxu0 }
 0x506   : > { %v1644_v17 = vpop.f32.mrb[17].mxu0 }
 0x507   : > { %1673 = vrot.lane.b32.xlu1 %v2488_v16, %s3165_s29  ;;  %v2690_v16 = vpack.c.bf16 %v402_v15, %v401_v14  ;;  %v2014_v15 = vrot.slane %v406_v10, %v517_v42 }
 0x508   : > { %1671 = vrot.lane.b32.xlu0 %v1644_v17, %s3165_s29  ;;  %s3043_s29 = scalar_lea.vmem %s3748_s22, 128 }
 0x509   : > { %p3044_p7 = scmp.ne.s32.totalorder %s3748_s22, %s3043_s29  ;;  %p3051_p6 = scmp.lt.s32.totalorder %s3049_s13, %s3043_s29 }
 0x50b   : > { %p3045_p11 = pnand %p3044_p7, %p3856_p8  ;;  %p3052_p9 = por %p3051_p6, %p3050_p1 }
 0x50d   : > { %p3046_p13 = pneg %p3045_p11 }
 0x50f   : > { %p3053_p5 = pnand %p3052_p9, %p3046_p13 }
 0x56b   : > { %v1658_v18 = vpop.permute.xlu1 %1657 }
 0x56c   : > { %v1656_v19 = vpop.permute.xlu0 %1655  ;;  %v1678_v26 = vsel %vm802_vm1, %v2455_v2, %v1658_v18  ;;  %v2674_v2 = vpack.c.bf16 %v394_v1, %v393_v63 }
 0x56d   : > { %v1677_v22 = vsel %vm802_vm1, %v1361_v3, %v1656_v19  ;;  %v395_v3 = vld [vmem:[%s3825_s5 + $0x30] sm:$0xff] }
 0x56e   : > { %v2678_v6 = vpack.c.bf16 %v396_v4, %v395_v3 }
 0x575   : > { %v1666_v20 = vpop.permute.xlu1 %1665 }
 0x576   : > { %v1664_v21 = vpop.permute.xlu0 %1663  ;;  %v1681_v29 = vsel %vm1679_vm3, %v1678_v26, %v1666_v20  ;;  %v1807_v26 = vsub.s32 7, %v3476_v37 }
 0x577   : > { %v1680_v27 = vsel %vm1679_vm3, %v1677_v22, %v1664_v21 }
 0x579   : > { %v1674_v25 = vpop.permute.xlu1 %1673 }
 0x57a   : > { %v1672_v28 = vpop.permute.xlu0 %1671  ;;  %v1684_v31 = vsel %vm1682_vm4, %v1681_v29, %v1674_v25  ;;  %v1801_v25 = vsub.s32 6, %v3476_v37 }
 0x57b   : > { %v1683_v30 = vsel %vm1682_vm4, %v1680_v27, %v1672_v28 }
 0x57c   : > { %2497 = vmatprep.mubr.msk.f32.mxu1 %vm433_vm0, %v1683_v30  ;;  %v1802_v27 = vrot.slane %v3479_v39, %v1801_v25  ;;  %v1808_v30 = vrot.slane %v3479_v39, %v1807_v26 }
 0x57d   : > { %2498 = vmatmul.mubr.msk.f32.vlgmr.msra.gmra.mrb[8].mxu1 %vm433_vm0, %v1684_v31 }
 0x57e   : > { %2669 = vmatpush3.bf16.msra.mxu1 %v2666_v60 }
 0x57f   : > { %2671 = vmatprep.subr.bf16.mxu1 %v2670_v62 }
 0x582   : > { %2673 = vmatpush3.bf16.msra.mxu1 %v2670_v62 }
 0x583   : > { %2675 = vmatprep.subr.bf16.mxu1 %v2674_v2 }
 0x586   : > { %2677 = vmatpush3.bf16.msra.mxu1 %v2674_v2 }
 0x587   : > { %2679 = vmatprep.subr.bf16.mxu1 %v2678_v6 }
 0x58a   : > { %2681 = vmatpush3.bf16.msra.mxu1 %v2678_v6 }
 0x58b   : > { %2683 = vmatprep.subr.bf16.mxu1 %v2682_v9 }
 0x58e   : > { %2685 = vmatpush3.bf16.msra.mxu1 %v2682_v9 }
 0x58f   : > { %2687 = vmatprep.subr.bf16.mxu1 %v2686_v13 }
 0x592   : > { %2689 = vmatpush3.bf16.msra.mxu1 %v2686_v13 }
 0x593   : > { %2691 = vmatprep.subr.bf16.mxu1 %v2690_v16 }
 0x596   : > { %2693 = vmatpush3.bf16.msra.mxu1 %v2690_v16 }
 0x650   : > { %v2499_v34 = vpop.f32.mrb[8].mxu1 }
 0x651   : > { %v1767_v35 = vadd.f32 %v2499_v34, %v1688_v33  ;;  %v1761_v40 = vpop.f32.mrb[9].mxu1 }
 0x652   : > { %v1762_v41 = vadd.f32 %v1761_v40, %v1688_v33 }
 0x653   : > { %v1771_v43 = vadd.f32 %v1767_v35, %v3444_v11 }
 0x654   : > { %v1770_v23 = vadd.f32 %v1762_v41, %v3432_v5  ;;  %v403_v41 = vld [vmem:[%s3825_s5 + $0x70] sm:$0xff] }
 0x655   : > { %v1775_v0 = vsel %vm433_vm0, %v1771_v43, 0.0 }
 0x656   : > { %1776 = vadd.xlane.f32.xlu1 %v1775_v0  ;;  %v1772_v45 = vsel %vm433_vm0, %v1770_v23, 0.0  ;;  %v1813_v0 = vsub.s32 4, %v3476_v37 }
 0x657   : > { %1773 = vadd.xlane.f32.xlu0 %v1772_v45 }
 0x658   : > { %v1814_v45 = vrot.slane %v3479_v39, %v1813_v0 }
 0x6e3   : > { %v1777_v46 = vpop.xlane.xlu1 %1776 }
 0x6e4   : > { %v1780_v47 = vmul.f32 0.03125, %v1777_v46  ;;  %v1774_v48 = vpop.xlane.xlu0 %1773 }
 0x6e5   : > { %v1779_v24 = vmul.f32 0.03125, %v1774_v48 }
 0x6e6   : > { %v3648_v44 = vsub.f32 %v1771_v43, %v1780_v47  ;;  %v404_v43 = vld [vmem:[%s3825_s5 + $0x78] sm:$0xff] }
 0x6e7   : > { %v3650_v49 = vsub.f32 %v1770_v23, %v1779_v24  ;;  %v2694_v23 = vpack.c.bf16 %v404_v43, %v403_v41 }
 0x6e8   : > { %v1784_v5 = vmul.f32 %v3648_v44, %v3648_v44 }
 0x6e9   : > { %v1783_v51 = vmul.f32 %v3650_v49, %v3650_v49  ;;  %2695 = vmatprep.subr.bf16.mxu1 %v2694_v23 }
 0x6ea   : > { %v1788_v52 = vsel %vm433_vm0, %v1784_v5, 0.0  ;;  %2697 = vmatpush3.bf16.msra.mxu1 %v2694_v23 }
 0x6eb   : > { %v1785_v11 = vsel %vm433_vm0, %v1783_v51, 0.0  ;;  %v1900_v51 = vsub.s32 5, %v3476_v37 }
 0x6ec   : > { %1786 = vadd.xlane.f32.xlu0 %v1785_v11 }
 0x6ed   : > { %v1901_v11 = vrot.slane %v3479_v39, %v1900_v51 }
 0x6f0   : > { %1789 = vadd.xlane.f32.xlu0 %v1788_v52 }
 0x779   : > { %v1787_v17 = vpop.xlane.xlu0 %1786 }
 0x77a   : > { %v1791_v18 = vmul.f32 0.03125, %v1787_v17 }
 0x77c   : > { %v1793_v19 = vadd.f32 1e-05, %v1791_v18 }
 0x77d   : > { %v1790_v20 = vpop.xlane.xlu0 %1789 }
 0x77e   : > { %2895 = vrsqrt.f32 %v1793_v19  ;;  %v1792_v21 = vmul.f32 0.03125, %v1790_v20 }
 0x780   : > { %v1794_v22 = vadd.f32 1e-05, %v1792_v21 }
 0x782   : > { %2897 = vrsqrt.f32 %v1794_v22 }
 0x788   : > { %v2896_v28 = vpop.eup %2895 }
 0x789   : > { %v1797_v29 = vmul.f32 %v2896_v28, %v3650_v49 }
 0x78b   : > { %v1803_v31 = vmul.f32 %v1802_v27, %v1797_v29 }
 0x78c   : > { %v2898_v32 = vpop.eup %2897 }
 0x78d   : > { %v1798_v33 = vmul.f32 %v2898_v32, %v3648_v44  ;;  %v1809_v34 = vadd.f32 %v1808_v30, %v1803_v31 }
 0x78f   : > { %v1804_v35 = vmul.f32 %v1802_v27, %v1798_v33  ;;  %2508 = vmatprep.mubr.msk.f32.mxu0 %vm433_vm0, %v1809_v34 }
 0x791   : > { %v1810_v40 = vadd.f32 %v1808_v30, %v1804_v35 }
 0x793   : > { %2509 = vmatmul.mubr.msk.f32.vlgmr.msra.gmra.mrb[18].mxu0 %vm433_vm0, %v1810_v40 }
 0x866   : > { %v2510_v46 = vpop.f32.mrb[18].mxu0 }
 0x867   : > { %v1893_v47 = vadd.f32 %v2510_v46, %v1814_v45  ;;  %v1887_v48 = vpop.f32.mrb[19].mxu0 }
 0x868   : > { %v1888_v24 = vadd.f32 %v1887_v48, %v1814_v45 }
 0x869   : > { %v1897_v49 = vmax.f32 %v1893_v47, 0.0 }
 0x86a   : > { %v1896_v44 = vmax.f32 %v1888_v24, 0.0 }
 0x86c   : > { %2543 = vmatprep.mubr.f32.mxu1 %v1896_v44 }
 0x86d   : > { %2544 = vmatmul.mubr.f32.vlgmr.msra.gmra.mrb[10].mxu1 %v1897_v49 }
 0x940   : > { %v2545_v5 = vpop.f32.mrb[10].mxu1 }
 0x941   : > { %v1974_v52 = vadd.f32 %v2545_v5, %v1901_v11  ;;  %v1968_v53 = vpop.f32.mrb[11].mxu1 }
 0x942   : > { %v1969_v54 = vadd.f32 %v1968_v53, %v1901_v11 }
 0x943   : > { %v1978_v55 = vadd.f32 %v1974_v52, %v1810_v40 }
 0x944   : > { %v1977_v56 = vadd.f32 %v1969_v54, %v1809_v34 }
 0x945   : > { %v1982_v50 = vsel %vm433_vm0, %v1978_v55, 0.0 }
 0x946   : > { %1983 = vadd.xlane.f32.xlu0 %v1982_v50  ;;  %v1979_v57 = vsel %vm433_vm0, %v1977_v56, 0.0 }
 0x947   : > { %1980 = vadd.xlane.f32.xlu1 %v1979_v57 }
 0x9d3   : > { %v1984_v36 = vpop.xlane.xlu0 %1983 }
 0x9d4   : > { %v1986_v58 = vmul.f32 0.03125, %v1984_v36  ;;  %v1981_v59 = vpop.xlane.xlu1 %1980 }
 0x9d5   : > { %v1985_v60 = vmul.f32 0.03125, %v1981_v59 }
 0x9d6   : > { %v1988_v61 = vsub.f32 %v1978_v55, %v1986_v58 }
 0x9d7   : > { %v1987_v62 = vsub.f32 %v1977_v56, %v1985_v60 }
 0x9d8   : > { %v1990_v39 = vmul.f32 %v1988_v61, %v1988_v61 }
 0x9d9   : > { %v1989_v63 = vmul.f32 %v1987_v62, %v1987_v62 }
 0x9da   : > { %v1994_v1 = vsel %vm433_vm0, %v1990_v39, 0.0 }
 0x9db   : > { %1995 = vadd.xlane.f32.xlu0 %v1994_v1  ;;  %v1991_v2 = vsel %vm433_vm0, %v1989_v63, 0.0 }
 0x9dc   : > { %1992 = vadd.xlane.f32.xlu1 %v1991_v2 }
 0xa68   : > { %v1996_v3 = vpop.xlane.xlu0 %1995 }
 0xa69   : > { %v1998_v4 = vmul.f32 0.03125, %v1996_v3  ;;  %v1993_v6 = vpop.xlane.xlu1 %1992 }
 0xa6a   : > { %v1997_v7 = vmul.f32 0.03125, %v1993_v6 }
 0xa6b   : > { %v2000_v8 = vadd.f32 1e-05, %v1998_v4 }
 0xa6c   : > { %v1999_v9 = vadd.f32 1e-05, %v1997_v7 }
 0xa6d   : > { %2899 = vrsqrt.f32 %v2000_v8 }
 0xa6e   : > { %2901 = vrsqrt.f32 %v1999_v9 }
 0xa77   : > { %v2900_v13 = vpop.eup %2899 }
 0xa78   : > { %v2902_v14 = vpop.eup %2901  ;;  %v2004_v16 = vmul.f32 %v2900_v13, %v1988_v61 }
 0xa79   : > { %v2003_v17 = vmul.f32 %v2902_v14, %v1987_v62 }
 0xa7a   : > { %v2010_v18 = vmul.f32 %v2008_v12, %v2004_v16 }
 0xa7b   : > { %v2009_v19 = vmul.f32 %v2008_v12, %v2003_v17 }
 0xa7c   : > { %v2016_v20 = vadd.f32 %v2014_v15, %v2010_v18 }
 0xa7d   : > { %v2015_v37 = vadd.f32 %v2014_v15, %v2009_v19 }
 0xa7e   : > { %2018 = vst.msk [vmem:[%s367_s17] sm:$0xff] %vm433_vm0, %v2016_v20 }
 0xa7f   : > { %2017 = vst.msk [vmem:[%s360_s14] sm:$0xff] %vm433_vm0, %v2015_v37 }
 0xa80   : > { %3056 = shalt.err (!%p3053_p5)
}
 0xa81   : > { %s3057_s21 = scalar_lea.hbm %s3746_s26, 128  ;;  %s3061_s17 = scalar_lea.hbm %s3828_s8, 256 }
 0xa82   : > { %p3058_p0 = scmp.ne.s32.totalorder %s3746_s26, %s3057_s21  ;;  %p3062_p3 = scmp.lt.u32.totalorder %s3746_s26, %s3828_s8 }
 0xa83   : > { %p3063_p4 = scmp.lt.u32.totalorder %s3061_s17, %s3057_s21  ;;  %p3065_p7 = scmp.lt.u32.totalorder %s3057_s21, %s3746_s26 }
 0xa84   : > { %p3059_p10 = pnand %p3058_p0, %p3856_p8 }
 0xa85   : > { %p3064_p12 = por %p3063_p4, %p3062_p3 }
 0xa86   : > { %p3060_p2 = pneg %p3059_p10 }
 0xa87   : > { %p3066_p11 = por %p3065_p7, %p3064_p12 }
 0xa89   : > { %p3067_p13 = pnand %p3066_p11, %p3060_p2 }
 0xa8b   : > { %3070 = shalt.err (!%p3067_p13)
}
 0xa8c   : > { %2719 = dma.vmem_to_hbm [thread:$0]  (%p3856_p8), %s3748_s22, 128, %s3746_s26, %s2025_s1  }
 0xa8d   : > { %s2020_s18 = scalar_lea.sflag [#allocation4], %s3735_s23  ;;  %s3071_s9 = scalar_lea.vmem %s3755_s24, 128 }
 0xa8e   : > { %p3072_p1 = scmp.ne.s32.totalorder %s3755_s24, %s3071_s9  ;;  %s3167_s10 = smov [#allocation11]  }
 0xa8f   : > { %s3075_s29 = sshll.u32 %s3167_s10, 4  ;;  %s3076_s29 = int_to_ptr.vmem [resolvable:$false] %s3075_s29 }
 0xa90   : > { %p3073_p6 = pnand %p3072_p1, %p3856_p8  ;;  %s3077_s11 = scalar_lea.vmem %s3076_s29, 256 }
 0xa91   : > { %p3078_p5 = scmp.lt.s32.totalorder %s3755_s24, %s3076_s29  ;;  %p3079_p0 = scmp.lt.s32.totalorder %s3077_s11, %s3071_s9 }
 0xa92   : > { %p3074_p9 = pneg %p3073_p6 }
 0xa93   : > { %p3080_p10 = por %p3079_p0, %p3078_p5 }
 0xa95   : > { %p3081_p2 = pnand %p3080_p10, %p3074_p9 }
 0xa97   : > { %3084 = shalt.err (!%p3081_p2)
}
 0xa98   : > { %s3085_s23 = scalar_lea.hbm %s3753_s12, 128  ;;  %s3089_s1 = scalar_lea.hbm %s3827_s7, 256 }
 0xa99   : > { %p3086_p3 = scmp.ne.s32.totalorder %s3753_s12, %s3085_s23  ;;  %p3090_p7 = scmp.lt.u32.totalorder %s3753_s12, %s3827_s7 }
 0xa9a   : > { %p3091_p11 = scmp.lt.u32.totalorder %s3089_s1, %s3085_s23  ;;  %p3093_p1 = scmp.lt.u32.totalorder %s3085_s23, %s3753_s12 }
 0xa9b   : > { %p3087_p4 = pnand %p3086_p3, %p3856_p8 }
 0xa9c   : > { %p3092_p13 = por %p3091_p11, %p3090_p7 }
 0xa9d   : > { %p3088_p12 = pneg %p3087_p4 }
 0xa9e   : > { %p3094_p6 = por %p3093_p1, %p3092_p13 }
 0xaa0   : > { %p3095_p9 = pnand %p3094_p6, %p3088_p12 }
 0xaa2   : > { %3098 = shalt.err (!%p3095_p9)
}
 0xaa3   : > { %2718 = dma.vmem_to_hbm [thread:$0]  (%p3856_p8), %s3755_s24, 128, %s3753_s12, %s2020_s18  }
 0xaa4 PF: > { %s3857_s21 = sld [smem:[#allocation22_spill]]  ;;  %p2755_p5 = scmp.ge.s32.totalorder %s3149_s30, 2 }
 0xaa5   : > { %s2063_s25 = sand.u32 1, %s3137_s27  }
 0xaa6   : > { %s2064_s19 = scalar_lea.sflag [#allocation4], %s2063_s25 }
 0xaaa   : > { %p3858_p0 = scmp.ne.s32.totalorder %s3857_s21, 0 }
 0xaac   : > { %p2739_p10 = pnand %p2755_p5, %p3858_p0 }
 0xaae   : > { %3128 = dma.done.wait (!%p2739_p10), %s2064_s19, 128  }
 0xaaf   : > { %3130 = vsyncadd (!%p2739_p10), %s2064_s19, 4294967168  ;;  %s2073_s17 = scalar_lea.sflag [#allocation13], %s2063_s25 }
 0xab0   : > { %3132 = dma.done.wait (!%p2739_p10), %s2073_s17, 128  }
 0xab1   : > { %3134 = vsyncadd (!%p2739_p10), %s2073_s17, 4294967168  ;;  %s3859_s30 = sld [smem:[#allocation20_spill]]  ;;  %s3860_s15 = sld [smem:[#allocation19_spill]] }
 0xab2   : > { %s3861_s29 = sld [smem:[#allocation21_spill]]  ;;  %s3862_s27 = smov %s3141_s28 }
 0xab7   : > { %p25_p8 = scmp.ge.s32.totalorder %s3859_s30, 4   ;;  %s3863_s28 = smov %s3860_s15 }
 0xab9   :  { %27 = sbr.rel (!%p25_p8) target bundleno = 10 (0xa), region = 122 }
 0xac0   :  { %2078 = vsyncpa [#allocation3], 1 }
 0xac1   :  { %2080 = vsyncpa [#allocation3 + $0x1], 1 }
 0xac2   :  { %2081 = vsyncpa [#allocation6], 1 }
 0xac3   :  { %2082 = vsyncpa [#allocation9], 1 }
 0xac4   :  { %2083 = vsyncpa [#allocation4], 1 }
 0xac5   :  { %2085 = vsyncpa [#allocation4 + $0x1], 1 }
 0xac6   :  { %2086 = vsyncpa [#allocation13], 1 }
 0xac7   :  { %2088 = vsyncpa [#allocation13 + $0x1], 1 }

</bundles_post_ra>
